<compile_context>
chip_gen: v6e
topology: v6e:2x2x1
jax: 0.10.0
libtpu: 0.0.40
codegen_flags: <defaults>
</compile_context>

<pallas_src>
import functools

import jax
import jax.numpy as jnp
from jax import lax
from jax.experimental import pallas as pl
from jax.experimental.pallas import tpu as pltpu


def _convlstm_cell_kernel(comb_ref, w_ref, b_ref, c_ref, h_out_ref, c_out_ref,
                          *, H, W, KH, KW, C_PAD, C_HID):
    """One batch element per grid step, channel-major (C, H*W) layout throughout.

    comb_ref : (1, C_PAD, HW + 2*SPAD)  concat([x, h_cur]) along channels, channel-padded to
                                        a sublane multiple and zero-padded by SPAD on both
                                        ends of the flattened spatial axis.
    w_ref    : (4*C_HID, KH*KW*C_PAD)   conv weight with the (ky, kx) taps folded into K.
    b_ref    : (4*C_HID, 1)             conv bias (broadcast along lanes).
    c_ref    : (1, C_HID, HW)           current cell state.
    h_out_ref: (1, C_HID, HW)           next hidden state.
    c_out_ref: (1, C_HID, HW)           next cell state.
    """
    HW = H * W
    PH, PW = KH // 2, KW // 2
    SPAD = PH * W + PW

    # Column index of every flattened output position; reused by every tap mask.
    col = lax.broadcasted_iota(jnp.int32, (1, HW), 1) % W

    # Gather the KH*KW shifted views. Row (dy) out-of-range reads land in the zero pad of
    # the flattened axis; column (dx) wraparound is fixed with a cheap VPU mask. Each view
    # is a static lane-window load of the already-resident VMEM block (no scratch, no
    # transposes). C_PAD is a multiple of 8 so the sublane concat below stays aligned.
    pieces = []
    for ky in range(KH):
        dy = ky - PH
        for kx in range(KW):
            dx = kx - PW
            start = SPAD + dy * W + dx                     # static, in [0, 2*SPAD]
            piece = comb_ref[0, :, start:start + HW]       # (C_PAD, HW)
            if dx > 0:
                piece = jnp.where(col < W - dx, piece, 0.0)
            elif dx < 0:
                piece = jnp.where(col >= -dx, piece, 0.0)
            pieces.append(piece)
    patch = jnp.concatenate(pieces, axis=0)                # (KH*KW*C_PAD, HW)

    # Single fused MXU matmul: gates land directly in (4*C_HID, HW) -> no output transpose.
    z = jnp.dot(w_ref[...], patch, preferred_element_type=jnp.float32)
    z = z + b_ref[...]                                     # (4*C_HID, 1) bcast over lanes

    # Gate order matches torch.split(combined_conv, hidden_dim, dim=1): i, f, o, g.
    ifo = jax.nn.sigmoid(z[:3 * C_HID, :])                 # one EUP pass over i|f|o
    g = jnp.tanh(z[3 * C_HID:, :])
    i = ifo[:C_HID, :]
    f = ifo[C_HID:2 * C_HID, :]
    o = ifo[2 * C_HID:, :]

    c_cur = c_ref[0].astype(jnp.float32)                   # (C_HID, HW), lane-dense load
    c_next = f * c_cur + i * g
    h_next = o * jnp.tanh(c_next)

    h_out_ref[0] = h_next.astype(h_out_ref.dtype)          # lane-dense (C_HID, HW) stores
    c_out_ref[0] = c_next.astype(c_out_ref.dtype)


def convlstm_cell_forward(x_nchw, h_nchw, c_nchw, weight_oihw, bias, kernel_size):
    """Matches ConvLSTMCell.forward semantics. Inputs/outputs are NCHW like PyTorch."""
    KH, KW = kernel_size                                   # odd kernels ('same' pad = k//2)
    B, C_IN, H, W = x_nchw.shape
    C_HID = h_nchw.shape[1]
    C_TOT = C_IN + C_HID
    C_PAD = -(-C_TOT // 8) * 8                             # sublane-aligned channel count
    HW = H * W
    PH, PW = KH // 2, KW // 2
    SPAD = PH * W + PW                                     # flat-spatial zero pad per side
    K = KH * KW * C_PAD

    # Channel concat + channel/flat-spatial zero pad: free reshapes of NCHW, no transposes.
    comb = jnp.concatenate([x_nchw.reshape(B, C_IN, HW),
                            h_nchw.reshape(B, C_HID, HW)], axis=1)        # (B, C_TOT, HW)
    comb = jnp.pad(comb, ((0, 0), (0, C_PAD - C_TOT), (SPAD, SPAD)))      # (B, C_PAD, HW+2*SPAD)

    # PyTorch conv weight (4*C_HID, C_TOT, KH, KW) -> fused matmul layout
    # (4*C_HID, KH*KW*C_PAD), K index = (ky*KW + kx)*C_PAD + c (padded channels are zero).
    w_pad = jnp.pad(weight_oihw, ((0, 0), (0, C_PAD - C_TOT), (0, 0), (0, 0)))
    w_fused = jnp.transpose(w_pad, (0, 2, 3, 1)).reshape(4 * C_HID, K)
    b2d = bias.reshape(4 * C_HID, 1)

    # Cell state / outputs in (channel, flattened-space) layout: a free reshape of NCHW.
    c_flat = c_nchw.reshape(B, C_HID, HW)

    kernel = functools.partial(_convlstm_cell_kernel, H=H, W=W, KH=KH, KW=KW,
                               C_PAD=C_PAD, C_HID=C_HID)

    h_flat, c_next_flat = pl.pallas_call(
        kernel,
        out_shape=(jax.ShapeDtypeStruct((B, C_HID, HW), x_nchw.dtype),
                   jax.ShapeDtypeStruct((B, C_HID, HW), x_nchw.dtype)),
        grid_spec=pltpu.PrefetchScalarGridSpec(
            num_scalar_prefetch=0,
            grid=(B,),
            in_specs=[
                pl.BlockSpec((1, C_PAD, HW + 2 * SPAD), lambda b: (b, 0, 0)),
                pl.BlockSpec((4 * C_HID, K), lambda b: (0, 0)),
                pl.BlockSpec((4 * C_HID, 1), lambda b: (0, 0)),
                pl.BlockSpec((1, C_HID, HW), lambda b: (b, 0, 0)),
            ],
            out_specs=[
                pl.BlockSpec((1, C_HID, HW), lambda b: (b, 0, 0)),
                pl.BlockSpec((1, C_HID, HW), lambda b: (b, 0, 0)),
            ],
        ),
        # "parallel" batch axis: shards across the 2 TensorCores on v7x; on single-TC
        # v5e/v6e it is just B serial steps (negligible per-step overhead at B=2).
        compiler_params=pltpu.CompilerParams(dimension_semantics=("parallel",)),
    )(comb, w_fused, b2d, c_flat)

    # Free reshapes back to NCHW like the PyTorch module returns.
    h_next = h_flat.reshape(B, C_HID, H, W)
    c_next = c_next_flat.reshape(B, C_HID, H, W)
    return h_next, c_next


def _reference_forward(x_nchw, h_nchw, c_nchw, weight_oihw, bias, kernel_size):
    """Pure-JAX reference mirroring the torch module (for correctness check)."""
    KH, KW = kernel_size
    combined = jnp.concatenate([x_nchw, h_nchw], axis=1)  # NCHW
    conv = lax.conv_general_dilated(
        combined, weight_oihw, window_strides=(1, 1),
        padding=((KH // 2, KH // 2), (KW // 2, KW // 2)),
        dimension_numbers=("NCHW", "OIHW", "NCHW"))
    conv = conv + bias[None, :, None, None]
    cc_i, cc_f, cc_o, cc_g = jnp.split(conv, 4, axis=1)
    i = jax.nn.sigmoid(cc_i)
    f = jax.nn.sigmoid(cc_f)
    o = jax.nn.sigmoid(cc_o)
    g = jnp.tanh(cc_g)
    c_next = f * c_nchw + i * g
    h_next = o * jnp.tanh(c_next)
    return h_next, c_next


if __name__ == "__main__":
    # Module config (small, consistent with ConvLSTMCell.__init__)
    input_dim = 4
    hidden_dim = 32
    kernel_size = (3, 3)
    B, H, W = 2, 16, 16

    key = jax.random.PRNGKey(0)
    k1, k2, k3, k4, k5 = jax.random.split(key, 5)

    # Deterministic synthetic parameters (nn.Conv2d(in=C_IN+C_HID, out=4*C_HID, k, bias=True))
    c_tot = input_dim + hidden_dim
    weight = jax.random.normal(k1, (4 * hidden_dim, c_tot, *kernel_size), jnp.float32) * 0.05
    bias = jax.random.normal(k2, (4 * hidden_dim,), jnp.float32) * 0.05

    # Inputs (NCHW, like PyTorch)
    x = jax.random.normal(k3, (B, input_dim, H, W), jnp.float32)
    h_cur = jax.random.normal(k4, (B, hidden_dim, H, W), jnp.float32)
    c_cur = jax.random.normal(k5, (B, hidden_dim, H, W), jnp.float32)

    h_next, c_next = convlstm_cell_forward(x, h_cur, c_cur, weight, bias, kernel_size)
    jax.block_until_ready((h_next, c_next))

    h_ref, c_ref = _reference_forward(x, h_cur, c_cur, weight, bias, kernel_size)
    # f32 MXU accumulation order differs from the XLA conv reference -> modest tolerance.
    assert jnp.allclose(h_next, h_ref, atol=5e-4, rtol=5e-4), "h_next mismatch"
    assert jnp.allclose(c_next, c_ref, atol=5e-4, rtol=5e-4), "c_next mismatch"

    print("KERNEL_OK")
</pallas_src>

<mosaic_0001>
module attributes {stable_mosaic.version = 11 : i64} {
  func.func @_convlstm_cell_kernel(%arg0: i32, %arg1: memref<1x40x290xf32, #tpu.memory_space<vmem>>, %arg2: memref<128x360xf32, #tpu.memory_space<vmem>>, %arg3: memref<128x1xf32, #tpu.memory_space<vmem>>, %arg4: memref<1x32x256xf32, #tpu.memory_space<vmem>>, %arg5: memref<1x32x256xf32, #tpu.memory_space<vmem>>, %arg6: memref<1x32x256xf32, #tpu.memory_space<vmem>>) attributes {dimension_semantics = [#tpu.dimension_semantics<parallel>], iteration_bounds = array<i64: 2>, scalar_prefetch = 0 : i64, scratch_operands = 0 : i64, tpu.core_type = #tpu.core_type<tc>, window_params = [{transform_indices = @transform_0, window_bounds = array<i64: 1, 40, 290>}, {pipeline_mode = #tpu.pipeline_mode<synchronous>, transform_indices = @transform_1, window_bounds = array<i64: 128, 360>}, {pipeline_mode = #tpu.pipeline_mode<synchronous>, transform_indices = @transform_2, window_bounds = array<i64: 128, 1>}, {transform_indices = @transform_3, window_bounds = array<i64: 1, 32, 256>}, {transform_indices = @transform_4, window_bounds = array<i64: 1, 32, 256>}, {transform_indices = @transform_5, window_bounds = array<i64: 1, 32, 256>}]} {
    %0 = tpu.iota {dimensions = array<i32: 1>} : vector<1x256xi32>
    %c16_i32 = arith.constant 16 : i32
    %c0_i32 = arith.constant 0 : i32
    %1 = arith.cmpi eq, %c16_i32, %c0_i32 : i32
    %c1_i32 = arith.constant 1 : i32
    %2 = arith.select %1, %c1_i32, %c16_i32 : i32
    %3 = vector.broadcast %2 : i32 to vector<1x256xi32>
    %4 = arith.remsi %0, %3 : vector<1x256xi32>
    %c0_i32_0 = arith.constant 0 : i32
    %5 = vector.broadcast %c0_i32_0 : i32 to vector<1x256xi32>
    %6 = arith.cmpi ne, %4, %5 : vector<1x256xi32>
    %c0_i32_1 = arith.constant 0 : i32
    %7 = vector.broadcast %c0_i32_1 : i32 to vector<1x256xi32>
    %8 = arith.cmpi slt, %4, %7 : vector<1x256xi32>
    %c0_i32_2 = arith.constant 0 : i32
    %9 = arith.cmpi slt, %2, %c0_i32_2 : i32
    %10 = vector.broadcast %9 : i1 to vector<1x256xi1>
    %11 = vector.broadcast %10 : vector<1x256xi1> to vector<1x256xi1>
    %12 = arith.xori %8, %11 : vector<1x256xi1>
    %13 = arith.andi %12, %6 : vector<1x256xi1>
    %14 = vector.broadcast %2 : i32 to vector<1x256xi32>
    %15 = arith.addi %4, %14 : vector<1x256xi32>
    %16 = arith.select %13, %15, %4 : vector<1x256xi1>, vector<1x256xi32>
    %c0 = arith.constant 0 : index
    %c0_3 = arith.constant 0 : index
    %c0_4 = arith.constant 0 : index
    %17 = vector.load %arg1[%c0, %c0_3, %c0_4] : memref<1x40x290xf32, #tpu.memory_space<vmem>>, vector<1x40x256xf32>
    %18 = vector.shape_cast %17 : vector<1x40x256xf32> to vector<40x256xf32>
    %c1_i32_5 = arith.constant 1 : i32
    %19 = vector.broadcast %c1_i32_5 : i32 to vector<1x256xi32>
    %20 = arith.cmpi sge, %16, %19 : vector<1x256xi32>
    %cst = arith.constant 0.000000e+00 : f32
    %21 = vector.shape_cast %20 : vector<1x256xi1> to vector<1x256xi1>
    %22 = vector.broadcast %21 : vector<1x256xi1> to vector<40x256xi1>
    %23 = vector.broadcast %cst : f32 to vector<40x256xf32>
    %24 = arith.select %22, %18, %23 : vector<40x256xi1>, vector<40x256xf32>
    %c0_6 = arith.constant 0 : index
    %c0_7 = arith.constant 0 : index
    %c1 = arith.constant 1 : index
    %25 = vector.load %arg1[%c0_6, %c0_7, %c1] : memref<1x40x290xf32, #tpu.memory_space<vmem>>, vector<1x40x256xf32>
    %26 = vector.shape_cast %25 : vector<1x40x256xf32> to vector<40x256xf32>
    %c0_8 = arith.constant 0 : index
    %c0_9 = arith.constant 0 : index
    %c2 = arith.constant 2 : index
    %27 = vector.load %arg1[%c0_8, %c0_9, %c2] : memref<1x40x290xf32, #tpu.memory_space<vmem>>, vector<1x40x256xf32>
    %28 = vector.shape_cast %27 : vector<1x40x256xf32> to vector<40x256xf32>
    %c15_i32 = arith.constant 15 : i32
    %29 = vector.broadcast %c15_i32 : i32 to vector<1x256xi32>
    %30 = arith.cmpi slt, %16, %29 : vector<1x256xi32>
    %cst_10 = arith.constant 0.000000e+00 : f32
    %31 = vector.shape_cast %30 : vector<1x256xi1> to vector<1x256xi1>
    %32 = vector.broadcast %31 : vector<1x256xi1> to vector<40x256xi1>
    %33 = vector.broadcast %cst_10 : f32 to vector<40x256xf32>
    %34 = arith.select %32, %28, %33 : vector<40x256xi1>, vector<40x256xf32>
    %c0_11 = arith.constant 0 : index
    %c0_12 = arith.constant 0 : index
    %c16 = arith.constant 16 : index
    %35 = vector.load %arg1[%c0_11, %c0_12, %c16] : memref<1x40x290xf32, #tpu.memory_space<vmem>>, vector<1x40x256xf32>
    %36 = vector.shape_cast %35 : vector<1x40x256xf32> to vector<40x256xf32>
    %c1_i32_13 = arith.constant 1 : i32
    %37 = vector.broadcast %c1_i32_13 : i32 to vector<1x256xi32>
    %38 = arith.cmpi sge, %16, %37 : vector<1x256xi32>
    %cst_14 = arith.constant 0.000000e+00 : f32
    %39 = vector.shape_cast %38 : vector<1x256xi1> to vector<1x256xi1>
    %40 = vector.broadcast %39 : vector<1x256xi1> to vector<40x256xi1>
    %41 = vector.broadcast %cst_14 : f32 to vector<40x256xf32>
    %42 = arith.select %40, %36, %41 : vector<40x256xi1>, vector<40x256xf32>
    %c0_15 = arith.constant 0 : index
    %c0_16 = arith.constant 0 : index
    %c17 = arith.constant 17 : index
    %43 = vector.load %arg1[%c0_15, %c0_16, %c17] : memref<1x40x290xf32, #tpu.memory_space<vmem>>, vector<1x40x256xf32>
    %44 = vector.shape_cast %43 : vector<1x40x256xf32> to vector<40x256xf32>
    %c0_17 = arith.constant 0 : index
    %c0_18 = arith.constant 0 : index
    %c18 = arith.constant 18 : index
    %45 = vector.load %arg1[%c0_17, %c0_18, %c18] : memref<1x40x290xf32, #tpu.memory_space<vmem>>, vector<1x40x256xf32>
    %46 = vector.shape_cast %45 : vector<1x40x256xf32> to vector<40x256xf32>
    %c15_i32_19 = arith.constant 15 : i32
    %47 = vector.broadcast %c15_i32_19 : i32 to vector<1x256xi32>
    %48 = arith.cmpi slt, %16, %47 : vector<1x256xi32>
    %cst_20 = arith.constant 0.000000e+00 : f32
    %49 = vector.shape_cast %48 : vector<1x256xi1> to vector<1x256xi1>
    %50 = vector.broadcast %49 : vector<1x256xi1> to vector<40x256xi1>
    %51 = vector.broadcast %cst_20 : f32 to vector<40x256xf32>
    %52 = arith.select %50, %46, %51 : vector<40x256xi1>, vector<40x256xf32>
    %c0_21 = arith.constant 0 : index
    %c0_22 = arith.constant 0 : index
    %c32 = arith.constant 32 : index
    %53 = vector.load %arg1[%c0_21, %c0_22, %c32] : memref<1x40x290xf32, #tpu.memory_space<vmem>>, vector<1x40x256xf32>
    %54 = vector.shape_cast %53 : vector<1x40x256xf32> to vector<40x256xf32>
    %c1_i32_23 = arith.constant 1 : i32
    %55 = vector.broadcast %c1_i32_23 : i32 to vector<1x256xi32>
    %56 = arith.cmpi sge, %16, %55 : vector<1x256xi32>
    %cst_24 = arith.constant 0.000000e+00 : f32
    %57 = vector.shape_cast %56 : vector<1x256xi1> to vector<1x256xi1>
    %58 = vector.broadcast %57 : vector<1x256xi1> to vector<40x256xi1>
    %59 = vector.broadcast %cst_24 : f32 to vector<40x256xf32>
    %60 = arith.select %58, %54, %59 : vector<40x256xi1>, vector<40x256xf32>
    %c0_25 = arith.constant 0 : index
    %c0_26 = arith.constant 0 : index
    %c33 = arith.constant 33 : index
    %61 = vector.load %arg1[%c0_25, %c0_26, %c33] : memref<1x40x290xf32, #tpu.memory_space<vmem>>, vector<1x40x256xf32>
    %62 = vector.shape_cast %61 : vector<1x40x256xf32> to vector<40x256xf32>
    %c0_27 = arith.constant 0 : index
    %c0_28 = arith.constant 0 : index
    %c34 = arith.constant 34 : index
    %63 = vector.load %arg1[%c0_27, %c0_28, %c34] : memref<1x40x290xf32, #tpu.memory_space<vmem>>, vector<1x40x256xf32>
    %64 = vector.shape_cast %63 : vector<1x40x256xf32> to vector<40x256xf32>
    %c15_i32_29 = arith.constant 15 : i32
    %65 = vector.broadcast %c15_i32_29 : i32 to vector<1x256xi32>
    %66 = arith.cmpi slt, %16, %65 : vector<1x256xi32>
    %cst_30 = arith.constant 0.000000e+00 : f32
    %67 = vector.shape_cast %66 : vector<1x256xi1> to vector<1x256xi1>
    %68 = vector.broadcast %67 : vector<1x256xi1> to vector<40x256xi1>
    %69 = vector.broadcast %cst_30 : f32 to vector<40x256xf32>
    %70 = arith.select %68, %64, %69 : vector<40x256xi1>, vector<40x256xf32>
    %71 = tpu.concatenate %24, %26, %34, %42, %44, %52, %60, %62, %70 in 0 : vector<40x256xf32>, vector<40x256xf32>, vector<40x256xf32>, vector<40x256xf32>, vector<40x256xf32>, vector<40x256xf32>, vector<40x256xf32>, vector<40x256xf32>, vector<40x256xf32> -> vector<360x256xf32>
    %c0_31 = arith.constant 0 : index
    %c0_32 = arith.constant 0 : index
    %72 = vector.load %arg2[%c0_31, %c0_32] : memref<128x360xf32, #tpu.memory_space<vmem>>, vector<128x360xf32>
    %cst_33 = arith.constant dense<0.000000e+00> : vector<128x256xf32>
    %73 = tpu.matmul %72, %71, %cst_33 {dimension_numbers = #tpu.dot_dimension_numbers<[1], [0], [0], [1], [0, 0, 1, 1], [], []>} : vector<128x360xf32>, vector<360x256xf32>, vector<128x256xf32> -> vector<128x256xf32>
    %c0_34 = arith.constant 0 : index
    %c0_35 = arith.constant 0 : index
    %74 = vector.load %arg3[%c0_34, %c0_35] : memref<128x1xf32, #tpu.memory_space<vmem>>, vector<128x1xf32>
    %75 = vector.broadcast %74 : vector<128x1xf32> to vector<128x256xf32>
    %76 = arith.addf %73, %75 : vector<128x256xf32>
    %77 = vector.extract_strided_slice %76 {offsets = [0, 0], sizes = [96, 256], strides = [1, 1]} : vector<128x256xf32> to vector<96x256xf32>
    %78 = arith.negf %77 : vector<96x256xf32>
    %79 = math.exp %78 : vector<96x256xf32>
    %cst_36 = arith.constant 1.000000e+00 : f32
    %80 = vector.broadcast %cst_36 : f32 to vector<96x256xf32>
    %81 = arith.addf %80, %79 : vector<96x256xf32>
    %82 = arith.divf %80, %81 : vector<96x256xf32>
    %83 = vector.extract_strided_slice %76 {offsets = [96, 0], sizes = [32, 256], strides = [1, 1]} : vector<128x256xf32> to vector<32x256xf32>
    %84 = math.tanh %83 : vector<32x256xf32>
    %85 = vector.extract_strided_slice %82 {offsets = [0, 0], sizes = [32, 256], strides = [1, 1]} : vector<96x256xf32> to vector<32x256xf32>
    %86 = vector.extract_strided_slice %82 {offsets = [32, 0], sizes = [32, 256], strides = [1, 1]} : vector<96x256xf32> to vector<32x256xf32>
    %87 = vector.extract_strided_slice %82 {offsets = [64, 0], sizes = [32, 256], strides = [1, 1]} : vector<96x256xf32> to vector<32x256xf32>
    %c0_37 = arith.constant 0 : index
    %c0_38 = arith.constant 0 : index
    %c0_39 = arith.constant 0 : index
    %88 = vector.load %arg4[%c0_37, %c0_38, %c0_39] : memref<1x32x256xf32, #tpu.memory_space<vmem>>, vector<1x32x256xf32>
    %89 = vector.shape_cast %88 : vector<1x32x256xf32> to vector<32x256xf32>
    %90 = arith.mulf %86, %89 : vector<32x256xf32>
    %91 = arith.mulf %85, %84 : vector<32x256xf32>
    %92 = arith.addf %90, %91 : vector<32x256xf32>
    %93 = math.tanh %92 : vector<32x256xf32>
    %94 = arith.mulf %87, %93 : vector<32x256xf32>
    %c0_40 = arith.constant 0 : index
    %c0_41 = arith.constant 0 : index
    %c0_42 = arith.constant 0 : index
    %95 = vector.load %arg5[%c0_40, %c0_41, %c0_42] : memref<1x32x256xf32, #tpu.memory_space<vmem>>, vector<1x32x256xf32>
    %96 = vector.shape_cast %95 : vector<1x32x256xf32> to vector<32x256xf32>
    %97 = vector.shape_cast %94 : vector<32x256xf32> to vector<1x32x256xf32>
    tpu.vector_store %arg5[%c0_40, %c0_41, %c0_42], %97 {strides = array<i32>} : memref<1x32x256xf32, #tpu.memory_space<vmem>>, vector<1x32x256xf32>,
    %c0_43 = arith.constant 0 : index
    %c0_44 = arith.constant 0 : index
    %c0_45 = arith.constant 0 : index
    %98 = vector.load %arg6[%c0_43, %c0_44, %c0_45] : memref<1x32x256xf32, #tpu.memory_space<vmem>>, vector<1x32x256xf32>
    %99 = vector.shape_cast %98 : vector<1x32x256xf32> to vector<32x256xf32>
    %100 = vector.shape_cast %92 : vector<32x256xf32> to vector<1x32x256xf32>
    tpu.vector_store %arg6[%c0_43, %c0_44, %c0_45], %100 {strides = array<i32>} : memref<1x32x256xf32, #tpu.memory_space<vmem>>, vector<1x32x256xf32>,
    return
  }
  func.func @transform_0(%arg0: i32) -> (i32, i32, i32) {
    %c0_i32 = arith.constant 0 : i32
    %c0_i32_0 = arith.constant 0 : i32
    %c0_i32_1 = arith.constant 0 : i32
    return %arg0, %c0_i32, %c0_i32_0 : i32, i32, i32
  }
  func.func @transform_1(%arg0: i32) -> (i32, i32) {
    %c0_i32 = arith.constant 0 : i32
    %c0_i32_0 = arith.constant 0 : i32
    %c0_i32_1 = arith.constant 0 : i32
    return %c0_i32, %c0_i32_0 : i32, i32
  }
  func.func @transform_2(%arg0: i32) -> (i32, i32) {
    %c0_i32 = arith.constant 0 : i32
    %c0_i32_0 = arith.constant 0 : i32
    %c0_i32_1 = arith.constant 0 : i32
    return %c0_i32, %c0_i32_0 : i32, i32
  }
  func.func @transform_3(%arg0: i32) -> (i32, i32, i32) {
    %c0_i32 = arith.constant 0 : i32
    %c0_i32_0 = arith.constant 0 : i32
    %c0_i32_1 = arith.constant 0 : i32
    return %arg0, %c0_i32, %c0_i32_0 : i32, i32, i32
  }
  func.func @transform_4(%arg0: i32) -> (i32, i32, i32) {
    %c0_i32 = arith.constant 0 : i32
    %c0_i32_0 = arith.constant 0 : i32
    %c0_i32_1 = arith.constant 0 : i32
    return %arg0, %c0_i32, %c0_i32_0 : i32, i32, i32
  }
  func.func @transform_5(%arg0: i32) -> (i32, i32, i32) {
    %c0_i32 = arith.constant 0 : i32
    %c0_i32_0 = arith.constant 0 : i32
    %c0_i32_1 = arith.constant 0 : i32
    return %arg0, %c0_i32, %c0_i32_0 : i32, i32, i32
  }
}

</mosaic_0001>

<bundles_post_ra>
// kernel: tpu_custom_call.1
= control target key start
LH: loop header
LB: loop body
LE: loop exit
PB: predicated region body
PF: predicated region fallthrough
CT: control target
= control target key end

     0   :  { %11 = vsyncpa [#allocation3], 0  ;;  %s3018_s0 = inlined_call_operand.vmem [shape: f32[2,40,290], index: 0, kind: input, shape index: {}]   ;;  %s3019_s1 = inlined_call_operand.vmem [shape: f32[128,360], index: 1, kind: input, shape index: {}]   ;;  %s3020_s2 = inlined_call_operand.vmem [shape: f32[128,1], index: 2, kind: input, shape index: {}]   ;;  %s3021_s3 = inlined_call_operand.vmem [shape: f32[2,32,256], index: 3, kind: input, shape index: {}]   ;;  %s3022_s4 = inlined_call_operand.hbm [shape: f32[2,32,256], index: 4, kind: output, shape index: {0}]   ;;  %s3023_s5 = inlined_call_operand.hbm [shape: f32[2,32,256], index: 5, kind: output, shape index: {1}]  }
   0x1   :  { %13 = vsyncpa [#allocation3 + $0x1], 0 }
   0x2   :  { %14 = vsyncpa [#allocation5], 0 }
   0x3   :  { %16 = vsyncpa [#allocation5 + $0x1], 0  ;;  %s2106_s18 = smov 0   ;;  %s2108_s19 = smov 0  }
   0x4   :  { %s2110_s20 = smov 0   ;;  %s2112_s21 = smov 0  }
   0x5 LB: > { %s2127_s22 = sadd.s32 4294967295, %s2060_s21   ;;  %s1663_s23 = sadd.s32 4294967294, %s2060_s21   ;;  %s2060_s21 = sphi %s2112_s21, %s3037_s21   ;;  %s2056_s20 = sphi %s2110_s20, %s3036_s20   ;;  %s2052_s19 = sphi %s2108_s19, %s3035_s19   ;;  %s2048_s18 = sphi %s2106_s18, %s3034_s18  }
   0x6   : > { %s2131_s24 = sadd.s32 1, %s2060_s21   ;;  %s123_s25 = sadd.s32 1, %s2056_s20 }
   0x7   : > { %s120_s26 = ssub.s32 %s2060_s21, %s2131_s24  ;;  %p133_p0 = scmp.ne.s32.totalorder %s2056_s20, %s2052_s19 }
   0x8   : > { %p121_p1 = scmp.eq.s32.totalorder %s120_s26, 0  ;;  %p134_p2 = scmp.eq.s32.totalorder %s2127_s22, 1 }
   0x9   : > { %p139_p3 = scmp.ne.s32.totalorder %s2052_s19, %s2048_s18  ;;  %p140_p4 = scmp.eq.s32.totalorder %s1663_s23, 1 }
   0xa   : > { %s2142_s27 = scalar_select %p121_p1, %s2056_s20, %s123_s25  }
   0xb   : > { %p2144_p5 = por %p134_p2, %p133_p0  ;;  %p2148_p6 = por %p140_p4, %p139_p3 }
   0xc   : > { %p1666_p7 = scmp.ge.s32.totalorder %s2060_s21, 1  ;;  %p206_p8 = scmp.lt.s32.totalorder %s2060_s21, 3 }
   0xe   : > { %p207_p9 = pnand %p1666_p7, %p206_p8 }
   0xf   : > { %p244_p10 = scmp.lt.s32.totalorder (!%p207_p9), %s2127_s22, 1  ;;  %s2062_s10 = smov (!%p207_p9), 112  }
  0x10   : > { %210 = sbr.rel (%p207_p9) target bundleno = 699 (0x2bb), region = 36  ;;  %s2063_s11 = smov (!%p207_p9), 126  }
  0x11   : > { %s2064_s12 = smov (!%p207_p9), 127   ;;  %s2065_s13 = smov (!%p207_p9), 96  }
  0x12   : > { %s2066_s14 = smov (!%p207_p9), 110   ;;  %s2067_s15 = smov (!%p207_p9), 94  }
  0x13   : > { %s2068_s16 = smov (!%p207_p9), 111   ;;  %s2069_s17 = smov (!%p207_p9), 95  }
  0x15   : > { %s2156_s30 = scalar_select %p244_p10, %s2127_s22, 1  ;;  %v254_v15 = vlaneseq  ;;  %vm424_vm1 = vcmask 916480   ;;  %vm363_vm3 = vcmask 1031168   ;;  %vm668_vm6 = vcmask 1039360   ;;  %v796_v22 = vld [vmem:[%s3019_s1 + $0x28] sm:$0xff]  ;;  %v803_v25 = vld [vmem:[%s3019_s1 + $0x60] sm:$0xff] }
  0x16   : > { %vm546_vm7 = vcmask 785408   ;;  %vm485_vm8 = vcmask 900096   ;;  %vm607_vm9 = vcmask 769024   ;;  %vm719_vm10 = vcmask 908288  }
  0x17   : > { %s1783_s6 = smul.u32 120, %s2156_s30  ;;  %v255_v16 = vand.u32 127, %v254_v15  ;;  %vm770_vm11 = vcmask 777216   ;;  %vm935_vm12 = vcmask 850944  }
  0x19   : > { %s2162_s9 = scalar_lea.vmem %s3018_s0, %s1783_s6  ;;  %v256_v17 = vadd.s32 128, %v255_v16  ;;  %v261_v21 = vand.u32 15, %v255_v16 }
  0x1a   : > { %v2165_v0 = vld [vmem:[%s2162_s9 + $0x8] sm:$0xff]  ;;  %v2168_v1 = vld [vmem:[%s2162_s9] sm:$0xff]  ;;  %v2175_v2 = vld [vmem:[%s2162_s9 + $0x10] sm:$0xff] }
  0x1b   : > { %396 = vrot.lane.b32.xlu0 %v2165_v0, %s2062_s10  ;;  %394 = vrot.lane.b32.xlu1 %v2168_v1, %s2062_s10  ;;  %v2178_v3 = vld [vmem:[%s2162_s9 + $0x68] sm:$0xff]  ;;  %v2184_v4 = vld [vmem:[%s2162_s9 + $0x70] sm:$0xff]  ;;  %v268_v18 = vand.u32 15, %v256_v17  ;;  %vm2303_vm2 = vcmp.ge.s32.totalorder %v261_v21, 1  ;;  %vm2321_vm5 = vcmp.lt.s32.totalorder %v261_v21, 15 }
  0x1c   : > { %v2187_v5 = vld [vmem:[%s2162_s9 + $0x60] sm:$0xff]  ;;  %v2192_v6 = vld [vmem:[%s2162_s9 + $0x50] sm:$0xff]  ;;  %v2195_v7 = vld [vmem:[%s2162_s9 + $0x58] sm:$0xff] }
  0x1d   : > { %v2200_v8 = vld [vmem:[%s2162_s9 + $0x48] sm:$0xff]  ;;  %v2203_v9 = vld [vmem:[%s2162_s9 + $0x38] sm:$0xff]  ;;  %v2208_v10 = vld [vmem:[%s2162_s9 + $0x40] sm:$0xff]  ;;  %vm2299_vm0 = vcmp.ge.s32.totalorder %v268_v18, 1  ;;  %vm2317_vm4 = vcmp.lt.s32.totalorder %v268_v18, 15 }
  0x1e   : > { %v2211_v11 = vld [vmem:[%s2162_s9 + $0x30] sm:$0xff]  ;;  %v2216_v12 = vld [vmem:[%s2162_s9 + $0x20] sm:$0xff]  ;;  %v2219_v13 = vld [vmem:[%s2162_s9 + $0x28] sm:$0xff] }
  0x1f   : > { %398 = vrot.lane.b32.xlu0 %v2175_v2, %s2062_s10  ;;  %359 = vrot.lane.b32.xlu1 %v2178_v3, %s2063_s11  ;;  %v2224_v14 = vld [vmem:[%s2162_s9 + $0x18] sm:$0xff]  ;;  %s2072_s9 = smov [#allocation4]  }
  0x23   : > { %361 = vrot.lane.b32.xlu0 %v2184_v4, %s2063_s11  ;;  %357 = vrot.lane.b32.xlu1 %v2187_v5, %s2063_s11 }
  0x27   : > { %353 = vrot.lane.b32.xlu0 %v2192_v6, %s2063_s11  ;;  %355 = vrot.lane.b32.xlu1 %v2195_v7, %s2063_s11 }
  0x2b   : > { %351 = vrot.lane.b32.xlu0 %v2200_v8, %s2063_s11  ;;  %347 = vrot.lane.b32.xlu1 %v2203_v9, %s2063_s11 }
  0x2f   : > { %349 = vrot.lane.b32.xlu0 %v2208_v10, %s2063_s11  ;;  %345 = vrot.lane.b32.xlu1 %v2211_v11, %s2063_s11 }
  0x33   : > { %341 = vrot.lane.b32.xlu0 %v2216_v12, %s2063_s11  ;;  %343 = vrot.lane.b32.xlu1 %v2219_v13, %s2063_s11 }
  0x37   : > { %339 = vrot.lane.b32.xlu0 %v2224_v14, %s2063_s11  ;;  %335 = vrot.lane.b32.xlu1 %v2165_v0, %s2063_s11 }
  0x3b   : > { %337 = vrot.lane.b32.xlu0 %v2175_v2, %s2063_s11  ;;  %333 = vrot.lane.b32.xlu1 %v2168_v1, %s2063_s11  ;;  %s1780_s11 = sshll.u32 %s2156_s30, 6  ;;  %s2899_s30 = sand.u32 1, %s2052_s19  }
  0x3c   : > { %s1528_s7 = scalar_lea.sflag [#allocation5], %s2899_s30 }
  0x3f   : > { %664 = vrot.lane.b32.xlu0 %v2178_v3, %s2064_s12  ;;  %666 = vrot.lane.b32.xlu1 %v2184_v4, %s2064_s12 }
  0x43   : > { %662 = vrot.lane.b32.xlu0 %v2187_v5, %s2064_s12  ;;  %658 = vrot.lane.b32.xlu1 %v2192_v6, %s2064_s12 }
  0x47   : > { %660 = vrot.lane.b32.xlu0 %v2195_v7, %s2064_s12  ;;  %656 = vrot.lane.b32.xlu1 %v2200_v8, %s2064_s12 }
  0x4b   : > { %652 = vrot.lane.b32.xlu0 %v2203_v9, %s2064_s12  ;;  %654 = vrot.lane.b32.xlu1 %v2208_v10, %s2064_s12 }
  0x4f   : > { %650 = vrot.lane.b32.xlu0 %v2211_v11, %s2064_s12  ;;  %646 = vrot.lane.b32.xlu1 %v2216_v12, %s2064_s12 }
  0x53   : > { %648 = vrot.lane.b32.xlu0 %v2219_v13, %s2064_s12  ;;  %644 = vrot.lane.b32.xlu1 %v2224_v14, %s2064_s12 }
  0x57   : > { %640 = vrot.lane.b32.xlu0 %v2165_v0, %s2064_s12  ;;  %642 = vrot.lane.b32.xlu1 %v2175_v2, %s2064_s12 }
  0x5b   : > { %638 = vrot.lane.b32.xlu0 %v2168_v1, %s2064_s12  ;;  %524 = vrot.lane.b32.xlu1 %v2216_v12, %s2065_s13 }
  0x5f   : > { %526 = vrot.lane.b32.xlu0 %v2219_v13, %s2065_s13  ;;  %522 = vrot.lane.b32.xlu1 %v2224_v14, %s2065_s13 }
  0x63   : > { %518 = vrot.lane.b32.xlu0 %v2165_v0, %s2065_s13  ;;  %520 = vrot.lane.b32.xlu1 %v2175_v2, %s2065_s13 }
  0x67   : > { %516 = vrot.lane.b32.xlu0 %v2168_v1, %s2065_s13  ;;  %481 = vrot.lane.b32.xlu1 %v2178_v3, %s2066_s14 }
  0x6b   : > { %483 = vrot.lane.b32.xlu0 %v2184_v4, %s2066_s14  ;;  %479 = vrot.lane.b32.xlu1 %v2187_v5, %s2066_s14 }
  0x6f   : > { %475 = vrot.lane.b32.xlu0 %v2192_v6, %s2066_s14  ;;  %477 = vrot.lane.b32.xlu1 %v2195_v7, %s2066_s14 }
  0x73   : > { %473 = vrot.lane.b32.xlu0 %v2200_v8, %s2066_s14  ;;  %469 = vrot.lane.b32.xlu1 %v2203_v9, %s2066_s14 }
  0x77   : > { %471 = vrot.lane.b32.xlu0 %v2208_v10, %s2066_s14  ;;  %603 = vrot.lane.b32.xlu1 %v2178_v3, %s2067_s15 }
  0x7b   : > { %605 = vrot.lane.b32.xlu0 %v2184_v4, %s2067_s15  ;;  %467 = vrot.lane.b32.xlu1 %v2211_v11, %s2066_s14 }
  0x7f   : > { %601 = vrot.lane.b32.xlu0 %v2187_v5, %s2067_s15  ;;  %463 = vrot.lane.b32.xlu1 %v2216_v12, %s2066_s14 }
  0x83   : > { %465 = vrot.lane.b32.xlu0 %v2219_v13, %s2066_s14  ;;  %597 = vrot.lane.b32.xlu1 %v2192_v6, %s2067_s15 }
  0x87   : > { %599 = vrot.lane.b32.xlu0 %v2195_v7, %s2067_s15  ;;  %461 = vrot.lane.b32.xlu1 %v2224_v14, %s2066_s14 }
  0x8b   : > { %595 = vrot.lane.b32.xlu0 %v2200_v8, %s2067_s15  ;;  %457 = vrot.lane.b32.xlu1 %v2165_v0, %s2066_s14 }
  0x8d   : > { %v397_v19 = vpop.permute.xlu0 %396  ;;  %v395_v20 = vpop.permute.xlu1 %394 }
  0x8e   : > { %v425_v27 = vsel %vm424_vm1, %v395_v20, %v397_v19 }
  0x8f   : > { %459 = vrot.lane.b32.xlu0 %v2175_v2, %s2066_s14  ;;  %591 = vrot.lane.b32.xlu1 %v2203_v9, %s2067_s15 }
  0x91   : > { %v399_v23 = vpop.permute.xlu0 %398  ;;  %v360_v24 = vpop.permute.xlu1 %359 }
  0x92   : > { %v426_v26 = vsel %vm424_vm1, %v397_v19, %v399_v23 }
  0x93   : > { %1672 = vmatprep.subr.msk.mxu0 %vm2299_vm0, %v426_v26  ;;  %593 = vrot.lane.b32.xlu0 %v2208_v10, %s2067_s15 }
  0x94   : > { %455 = vrot.lane.b32.xlu1 %v2168_v1, %s2066_s14  ;;  %1673 = vmatpush1.msk.msra.mxu0 %vm2303_vm2, %v425_v27  ;;  %s2895_s14 = scalar_lea.vmem %s3021_s3, %s1780_s11 }
  0x95   : > { %v362_v29 = vpop.permute.xlu0 %361  ;;  %v358_v30 = vpop.permute.xlu1 %357 }
  0x96   : > { %v373_v32 = vsel %vm363_vm3, %v360_v24, %v362_v29  ;;  %v372_v33 = vsel %vm363_vm3, %v358_v30, %v360_v24 }
  0x97   : > { %589 = vrot.lane.b32.xlu0 %v2211_v11, %s2067_s15  ;;  %1674 = vmatprep.subr.msk.mxu0 %vm2317_vm4, %v373_v32 }
  0x98   : > { %585 = vrot.lane.b32.xlu1 %v2216_v12, %s2067_s15  ;;  %1675 = vmatpush1.msk.msra.mxu0 %vm2321_vm5, %v372_v33 }
  0x99   : > { %v354_v34 = vpop.permute.xlu0 %353  ;;  %v356_v35 = vpop.permute.xlu1 %355 }
  0x9a   : > { %v371_v36 = vsel %vm363_vm3, %v354_v34, %v356_v35 }
  0x9b   : > { %587 = vrot.lane.b32.xlu0 %v2219_v13, %s2067_s15  ;;  %1676 = vmatprep.subr.msk.mxu0 %vm2317_vm4, %v371_v36 }
  0x9c   : > { %715 = vrot.lane.b32.xlu1 %v2178_v3, %s2068_s16 }
  0x9d   : > { %v352_v37 = vpop.permute.xlu0 %351  ;;  %v348_v38 = vpop.permute.xlu1 %347 }
  0x9e   : > { %v370_v39 = vsel %vm363_vm3, %v352_v37, %v354_v34 }
  0x9f   : > { %717 = vrot.lane.b32.xlu0 %v2184_v4, %s2068_s16  ;;  %1677 = vmatpush1.msk.msra.mxu0 %vm2321_vm5, %v370_v39 }
  0xa0   : > { %583 = vrot.lane.b32.xlu1 %v2224_v14, %s2067_s15 }
  0xa1   : > { %v350_v40 = vpop.permute.xlu0 %349  ;;  %v346_v41 = vpop.permute.xlu1 %345 }
  0xa2   : > { %v369_v42 = vsel %vm363_vm3, %v348_v38, %v350_v40  ;;  %v368_v43 = vsel %vm363_vm3, %v346_v41, %v348_v38 }
  0xa3   : > { %713 = vrot.lane.b32.xlu0 %v2187_v5, %s2068_s16  ;;  %1678 = vmatprep.subr.msk.mxu0 %vm2317_vm4, %v369_v42 }
  0xa4   : > { %579 = vrot.lane.b32.xlu1 %v2165_v0, %s2067_s15  ;;  %1679 = vmatpush1.msk.msra.mxu0 %vm2321_vm5, %v368_v43 }
  0xa5   : > { %v342_v44 = vpop.permute.xlu0 %341  ;;  %v344_v45 = vpop.permute.xlu1 %343 }
  0xa6   : > { %v367_v46 = vsel %vm363_vm3, %v342_v44, %v344_v45 }
  0xa7   : > { %581 = vrot.lane.b32.xlu0 %v2175_v2, %s2067_s15  ;;  %1680 = vmatprep.subr.msk.mxu0 %vm2317_vm4, %v367_v46 }
  0xa8   : > { %709 = vrot.lane.b32.xlu1 %v2192_v6, %s2068_s16 }
  0xa9   : > { %v340_v47 = vpop.permute.xlu0 %339  ;;  %v336_v48 = vpop.permute.xlu1 %335 }
  0xaa   : > { %v366_v49 = vsel %vm363_vm3, %v340_v47, %v342_v44 }
  0xab   : > { %711 = vrot.lane.b32.xlu0 %v2195_v7, %s2068_s16  ;;  %1681 = vmatpush1.msk.msra.mxu0 %vm2321_vm5, %v366_v49 }
  0xac   : > { %577 = vrot.lane.b32.xlu1 %v2168_v1, %s2067_s15  ;;  %s1667_s15 = sshll.u32 %s2899_s30, 6 }
  0xad   : > { %v338_v50 = vpop.permute.xlu0 %337  ;;  %v334_v51 = vpop.permute.xlu1 %333 }
  0xae   : > { %v365_v52 = vsel %vm363_vm3, %v336_v48, %v338_v50  ;;  %v364_v53 = vsel %vm363_vm3, %v334_v51, %v336_v48 }
  0xaf   : > { %707 = vrot.lane.b32.xlu0 %v2200_v8, %s2068_s16  ;;  %1682 = vmatprep.subr.msk.mxu0 %vm2317_vm4, %v365_v52 }
  0xb0   : > { %703 = vrot.lane.b32.xlu1 %v2203_v9, %s2068_s16  ;;  %1683 = vmatpush1.msk.msra.mxu0 %vm2321_vm5, %v364_v53 }
  0xb1   : > { %v665_v54 = vpop.permute.xlu0 %664  ;;  %v667_v55 = vpop.permute.xlu1 %666 }
  0xb2   : > { %v678_v56 = vsel %vm668_vm6, %v665_v54, %v667_v55 }
  0xb3   : > { %705 = vrot.lane.b32.xlu0 %v2208_v10, %s2068_s16  ;;  %996 = vmatprep.subr.mxu0 %v678_v56 }
  0xb4   : > { %766 = vrot.lane.b32.xlu1 %v2178_v3, %s2069_s17 }
  0xb5   : > { %v663_v57 = vpop.permute.xlu0 %662  ;;  %v659_v58 = vpop.permute.xlu1 %658 }
  0xb6   : > { %v677_v59 = vsel %vm668_vm6, %v663_v57, %v665_v54 }
  0xb7   : > { %768 = vrot.lane.b32.xlu0 %v2184_v4, %s2069_s17  ;;  %997 = vmatpush1.msra.mxu0 %v677_v59 }
  0xb8   : > { %701 = vrot.lane.b32.xlu1 %v2211_v11, %s2068_s16 }
  0xb9   : > { %v661_v60 = vpop.permute.xlu0 %660  ;;  %v657_v61 = vpop.permute.xlu1 %656 }
  0xba   : > { %v676_v62 = vsel %vm668_vm6, %v659_v58, %v661_v60  ;;  %v675_v63 = vsel %vm668_vm6, %v657_v61, %v659_v58 }
  0xbb   : > { %764 = vrot.lane.b32.xlu0 %v2187_v5, %s2069_s17  ;;  %998 = vmatprep.subr.mxu0 %v676_v62  ;;  %v792_v62 = vld [vmem:[%s3019_s1 + $0x8] sm:$0xff] }
  0xbc   : > { %697 = vrot.lane.b32.xlu1 %v2216_v12, %s2068_s16  ;;  %999 = vmatpush1.msra.mxu0 %v675_v63 }
  0xbd   : > { %v653_v15 = vpop.permute.xlu0 %652  ;;  %v655_v16 = vpop.permute.xlu1 %654  ;;  %1048 = vmatprep.mubr.f32.mxu0 %v792_v62 }
  0xbe   : > { %v674_v17 = vsel %vm668_vm6, %v653_v15, %v655_v16 }
  0xbf   : > { %699 = vrot.lane.b32.xlu0 %v2219_v13, %s2068_s16  ;;  %1000 = vmatprep.subr.mxu0 %v674_v17 }
  0xc0   : > { %760 = vrot.lane.b32.xlu1 %v2192_v6, %s2069_s17 }
  0xc1   : > { %v651_v18 = vpop.permute.xlu0 %650  ;;  %v647_v19 = vpop.permute.xlu1 %646 }
  0xc2   : > { %v673_v20 = vsel %vm668_vm6, %v651_v18, %v653_v15 }
  0xc3   : > { %762 = vrot.lane.b32.xlu0 %v2195_v7, %s2069_s17  ;;  %1001 = vmatpush1.msra.mxu0 %v673_v20 }
  0xc4   : > { %695 = vrot.lane.b32.xlu1 %v2224_v14, %s2068_s16 }
  0xc5   : > { %v649_v21 = vpop.permute.xlu0 %648  ;;  %v645_v23 = vpop.permute.xlu1 %644 }
  0xc6   : > { %v672_v24 = vsel %vm668_vm6, %v647_v19, %v649_v21  ;;  %v671_v26 = vsel %vm668_vm6, %v645_v23, %v647_v19  ;;  %v2070_v19 = vmov 0.0  }
  0xc7   : > { %758 = vrot.lane.b32.xlu0 %v2200_v8, %s2069_s17  ;;  %1002 = vmatprep.subr.mxu0 %v672_v24 }
  0xc8   : > { %691 = vrot.lane.b32.xlu1 %v2165_v0, %s2068_s16  ;;  %1003 = vmatpush1.msra.mxu0 %v671_v26 }
  0xc9   : > { %v641_v27 = vpop.permute.xlu0 %640  ;;  %v643_v29 = vpop.permute.xlu1 %642  ;;  %1209 = vmatprep.mubr.f32.mxu1 %v2070_v19 }
  0xca   : > { %v670_v30 = vsel %vm668_vm6, %v641_v27, %v643_v29 }
  0xcb   : > { %693 = vrot.lane.b32.xlu0 %v2175_v2, %s2068_s16  ;;  %1004 = vmatprep.subr.mxu0 %v670_v30 }
  0xcc   : > { %754 = vrot.lane.b32.xlu1 %v2203_v9, %s2069_s17 }
  0xcd   : > { %v639_v32 = vpop.permute.xlu0 %638  ;;  %v525_v33 = vpop.permute.xlu1 %524 }
  0xce   : > { %v669_v34 = vsel %vm668_vm6, %v639_v32, %v641_v27 }
  0xcf   : > { %756 = vrot.lane.b32.xlu0 %v2208_v10, %s2069_s17  ;;  %1005 = vmatpush1.msra.mxu0 %v669_v34 }
  0xd0   : > { %689 = vrot.lane.b32.xlu1 %v2168_v1, %s2068_s16  ;;  %1684 = vmatprep.subr.msk.mxu0 %vm2299_vm0, %v2178_v3  ;;  %s2910_s16 = scalar_lea.vmem [#allocation4], %s1667_s15 }
  0xd1   : > { %v527_v35 = vpop.permute.xlu0 %526  ;;  %1685 = vmatpush1.msk.msra.mxu0 %vm2303_vm2, %v2187_v5  ;;  %v523_v36 = vpop.permute.xlu1 %522  ;;  %s1557_s23 = sshll.u32 %s2910_s16, 4  ;;  %s2937_s23 = int_to_ptr.vmem [resolvable:$true] %s1557_s23 }
  0xd2   : > { %1686 = vmatprep.subr.msk.mxu0 %vm2299_vm0, %v2192_v6  ;;  %v550_v39 = vsel %vm546_vm7, %v525_v33, %v527_v35  ;;  %v549_v42 = vsel %vm546_vm7, %v523_v36, %v525_v33  ;;  %s1970_s8 = scalar_lea.vmem %s2937_s23, 1024 }
  0xd3   : > { %752 = vrot.lane.b32.xlu0 %v2211_v11, %s2069_s17  ;;  %1687 = vmatpush1.msk.msra.mxu0 %vm2303_vm2, %v2200_v8  ;;  %p1971_p11 = scmp.ne.s32.totalorder %s2937_s23, %s1970_s8 }
  0xd4   : > { %420 = vrot.lane.b32.xlu1 %v2178_v3, %s2062_s10  ;;  %1688 = vmatprep.subr.msk.mxu0 %vm2299_vm0, %v2203_v9 }
  0xd5   : > { %v519_v37 = vpop.permute.xlu0 %518  ;;  %1689 = vmatpush1.msk.msra.mxu0 %vm2303_vm2, %v2211_v11  ;;  %v521_v38 = vpop.permute.xlu1 %520  ;;  %p1972_p12 = pnand %p1971_p11, %p2144_p5 }
  0xd6   : > { %1690 = vmatprep.subr.msk.mxu0 %vm2299_vm0, %v2216_v12  ;;  %v548_v43 = vsel %vm546_vm7, %v519_v37, %v521_v38 }
  0xd7   : > { %422 = vrot.lane.b32.xlu0 %v2184_v4, %s2062_s10  ;;  %1691 = vmatpush1.msk.msra.mxu0 %vm2303_vm2, %v2224_v14  ;;  %p1973_p13 = pneg %p1972_p12 }
  0xd8   : > { %748 = vrot.lane.b32.xlu1 %v2216_v12, %s2069_s17  ;;  %1692 = vmatprep.subr.msk.mxu0 %vm2299_vm0, %v2165_v0 }
  0xd9   : > { %v517_v40 = vpop.permute.xlu0 %516  ;;  %1693 = vmatpush1.msk.msra.mxu0 %vm2303_vm2, %v2168_v1  ;;  %v482_v41 = vpop.permute.xlu1 %481 }
  0xda   : > { %1694 = vmatprep.subr.msk.mxu0 %vm2299_vm0, %v550_v39  ;;  %v547_v44 = vsel %vm546_vm7, %v517_v40, %v519_v37 }
  0xdb   : > { %750 = vrot.lane.b32.xlu0 %v2219_v13, %s2069_s17  ;;  %1695 = vmatpush2.msk.msra.mxu0 %vm2303_vm2, %v549_v42 }
  0xdc   : > { %418 = vrot.lane.b32.xlu1 %v2187_v5, %s2062_s10  ;;  %1696 = vmatprep.subr.msk.mxu0 %vm2299_vm0, %v548_v43 }
  0xdd   : > { %v484_v45 = vpop.permute.xlu0 %483  ;;  %1697 = vmatpush2.msk.msra.mxu0 %vm2303_vm2, %v547_v44  ;;  %v480_v46 = vpop.permute.xlu1 %479 }
  0xde   : > { %v495_v47 = vsel %vm485_vm8, %v482_v41, %v484_v45  ;;  %v494_v48 = vsel %vm485_vm8, %v480_v46, %v482_v41 }
  0xdf   : > { %746 = vrot.lane.b32.xlu0 %v2224_v14, %s2069_s17  ;;  %1698 = vmatprep.subr.msk.mxu0 %vm2317_vm4, %v495_v47 }
  0xe0   : > { %414 = vrot.lane.b32.xlu1 %v2192_v6, %s2062_s10  ;;  %1699 = vmatpush2.msk.msra.mxu0 %vm2321_vm5, %v494_v48 }
  0xe1   : > { %v476_v49 = vpop.permute.xlu0 %475  ;;  %v478_v50 = vpop.permute.xlu1 %477 }
  0xe2   : > { %v493_v51 = vsel %vm485_vm8, %v476_v49, %v478_v50 }
  0xe3   : > { %416 = vrot.lane.b32.xlu0 %v2195_v7, %s2062_s10  ;;  %1700 = vmatprep.subr.msk.mxu0 %vm2317_vm4, %v493_v51 }
  0xe4   : > { %742 = vrot.lane.b32.xlu1 %v2165_v0, %s2069_s17 }
  0xe5   : > { %v474_v52 = vpop.permute.xlu0 %473  ;;  %v470_v53 = vpop.permute.xlu1 %469 }
  0xe6   : > { %v492_v54 = vsel %vm485_vm8, %v474_v52, %v476_v49 }
  0xe7   : > { %744 = vrot.lane.b32.xlu0 %v2175_v2, %s2069_s17  ;;  %1701 = vmatpush2.msk.msra.mxu0 %vm2321_vm5, %v492_v54 }
  0xe8   : > { %412 = vrot.lane.b32.xlu1 %v2200_v8, %s2062_s10 }
  0xe9   : > { %v472_v55 = vpop.permute.xlu0 %471  ;;  %v604_v56 = vpop.permute.xlu1 %603 }
  0xea   : > { %v491_v57 = vsel %vm485_vm8, %v470_v53, %v472_v55 }
  0xeb   : > { %740 = vrot.lane.b32.xlu0 %v2168_v1, %s2069_s17  ;;  %1702 = vmatprep.subr.msk.mxu0 %vm2317_vm4, %v491_v57  ;;  %s1781_s17 = sshll.u32 %s2127_s22, 10 }
  0xec   : > { %408 = vrot.lane.b32.xlu1 %v2203_v9, %s2062_s10  ;;  %s2935_s6 = scalar_lea.hbm %s3023_s5, %s1781_s17 }
  0xed   : > { %v606_v0 = vpop.permute.xlu0 %605  ;;  %v468_v2 = vpop.permute.xlu1 %467 }
  0xee   : > { %v490_v58 = vsel %vm485_vm8, %v468_v2, %v470_v53  ;;  %v617_v59 = vsel %vm607_vm9, %v604_v56, %v606_v0 }
  0xef   : > { %410 = vrot.lane.b32.xlu0 %v2208_v10, %s2062_s10  ;;  %1703 = vmatpush2.msk.msra.mxu0 %vm2321_vm5, %v490_v58 }
  0xf0   : > { %542 = vrot.lane.b32.xlu1 %v2178_v3, %s2065_s13  ;;  %1716 = vmatprep.subr.msk.mxu1 %vm2317_vm4, %v617_v59 }
  0xf1   : > { %v602_v1 = vpop.permute.xlu0 %601  ;;  %v464_v60 = vpop.permute.xlu1 %463 }
  0xf2   : > { %v616_v61 = vsel %vm607_vm9, %v602_v1, %v604_v56 }
  0xf3   : > { %544 = vrot.lane.b32.xlu0 %v2184_v4, %s2065_s13  ;;  %1717 = vmatpush1.msk.msra.mxu1 %vm2321_vm5, %v616_v61  ;;  %v840_v61 = vld [vmem:[%s3020_s2 + $0x8] sm:$0xff] }
  0xf4   : > { %406 = vrot.lane.b32.xlu1 %v2211_v11, %s2062_s10 }
  0xf5   : > { %v466_v3 = vpop.permute.xlu0 %465  ;;  %v598_v63 = vpop.permute.xlu1 %597 }
  0xf6   : > { %v489_v15 = vsel %vm485_vm8, %v464_v60, %v466_v3 }
  0xf7   : > { %540 = vrot.lane.b32.xlu0 %v2187_v5, %s2065_s13  ;;  %1704 = vmatprep.subr.msk.mxu0 %vm2317_vm4, %v489_v15  ;;  %v842_v15 = vld [vmem:[%s3020_s2 + $0x18] sm:$0xff] }
  0xf8   : > { %402 = vrot.lane.b32.xlu1 %v2216_v12, %s2062_s10 }
  0xf9   : > { %v600_v4 = vpop.permute.xlu0 %599  ;;  %v462_v16 = vpop.permute.xlu1 %461 }
  0xfa   : > { %v615_v17 = vsel %vm607_vm9, %v598_v63, %v600_v4  ;;  %v488_v18 = vsel %vm485_vm8, %v462_v16, %v464_v60  ;;  %v839_v60 = vld [vmem:[%s3020_s2] sm:$0xff]  ;;  %v841_v16 = vld [vmem:[%s3020_s2 + $0x10] sm:$0xff] }
  0xfb   : > { %404 = vrot.lane.b32.xlu0 %v2219_v13, %s2062_s10  ;;  %1705 = vmatpush2.msk.msra.mxu0 %vm2321_vm5, %v488_v18 }
  0xfc   : > { %536 = vrot.lane.b32.xlu1 %v2192_v6, %s2065_s13  ;;  %1718 = vmatprep.subr.msk.mxu1 %vm2317_vm4, %v615_v17 }
  0xfd   : > { %v596_v5 = vpop.permute.xlu0 %595  ;;  %v458_v12 = vpop.permute.xlu1 %457 }
  0xfe   : > { %v614_v20 = vsel %vm607_vm9, %v596_v5, %v598_v63  ;;  %v2071_v63 = vmov 0   ;;  %v844_v5 = vld [vmem:[%s3020_s2 + $0x28] sm:$0xff] }
  0xff   : > { %538 = vrot.lane.b32.xlu0 %v2195_v7, %s2065_s13  ;;  %1719 = vmatpush1.msk.msra.mxu1 %vm2321_vm5, %v614_v20  ;;  %v843_v20 = vld [vmem:[%s3020_s2 + $0x20] sm:$0xff] }
 0x100   : > { %400 = vrot.lane.b32.xlu1 %v2224_v14, %s2062_s10  ;;  %1840 = vset.pattern.permute.xlu0 %v2071_v63  ;;  %s1974_s10 = sshll.u32 %s2072_s9, 4  ;;  %s1975_s10 = int_to_ptr.vmem [resolvable:$false] %s1974_s10 }
 0x101   : > { %v460_v6 = vpop.permute.xlu0 %459  ;;  %v592_v13 = vpop.permute.xlu1 %591  ;;  %1841 = vset.pattern.permute.xlu1 %v2071_v63  ;;  %v791_v63 = vld [vmem:[%s3019_s1] sm:$0xff]  ;;  %s1976_s11 = scalar_lea.vmem %s1975_s10, 2048  ;;  %p1977_p0 = scmp.lt.s32.totalorder %s2937_s23, %s1975_s10 }
 0x102   : > { %v487_v21 = vsel %vm485_vm8, %v458_v12, %v460_v6  ;;  %p1978_p1 = scmp.lt.s32.totalorder %s1976_s11, %s1970_s8 }
 0x103   : > { %534 = vrot.lane.b32.xlu0 %v2200_v8, %s2065_s13  ;;  %1706 = vmatprep.subr.msk.mxu0 %vm2317_vm4, %v487_v21 }
 0x104   : > { %530 = vrot.lane.b32.xlu1 %v2203_v9, %s2065_s13  ;;  %p1979_p2 = por %p1978_p1, %p1977_p0 }
 0x105   : > { %v594_v7 = vpop.permute.xlu0 %593 }
 0x106   : > { %v613_v23 = vsel %vm607_vm9, %v592_v13, %v594_v7  ;;  %v456_v24 = vpop.permute.xlu1 %455  ;;  %v846_v7 = vld [vmem:[%s3020_s2 + $0x38] sm:$0xff]  ;;  %p1980_p3 = pnand %p1979_p2, %p1973_p13 }
 0x107   : > { %v486_v26 = vsel %vm485_vm8, %v456_v24, %v458_v12  ;;  %532 = vrot.lane.b32.xlu0 %v2208_v10, %s2065_s13  ;;  %1720 = vmatprep.subr.msk.mxu1 %vm2317_vm4, %v613_v23  ;;  %v845_v24 = vld [vmem:[%s3020_s2 + $0x30] sm:$0xff] }
 0x108   : > { %528 = vrot.lane.b32.xlu1 %v2211_v11, %s2065_s13  ;;  %1707 = vmatpush2.msk.msra.mxu0 %vm2321_vm5, %v486_v26 }
 0x109   : > { %v590_v8 = vpop.permute.xlu0 %589 }
 0x10a   : > { %v612_v9 = vsel %vm607_vm9, %v590_v8, %v592_v13  ;;  %v586_v14 = vpop.permute.xlu1 %585 }
 0x10b   : > { %1721 = vmatpush1.msk.msra.mxu1 %vm2321_vm5, %v612_v9  ;;  %857 = vperm.xlu0 %1840, %v839_v60   ;;  %v848_v9 = vld [vmem:[%s3020_s2 + $0x48] sm:$0xff] }
 0x10c   : > { %862 = vperm.xlu1 %1841, %v840_v61  }
 0x10d   : > { %v588_v27 = vpop.permute.xlu0 %587 }
 0x10e   : > { %v611_v29 = vsel %vm607_vm9, %v586_v14, %v588_v27  ;;  %v716_v10 = vpop.permute.xlu1 %715  ;;  %v847_v27 = vld [vmem:[%s3020_s2 + $0x40] sm:$0xff] }
 0x10f   : > { %1722 = vmatprep.subr.msk.mxu1 %vm2317_vm4, %v611_v29  ;;  %872 = vperm.xlu0 %1840, %v842_v15  }
 0x110   : > { %867 = vperm.xlu1 %1841, %v841_v16  }
 0x111   : > { %v718_v30 = vpop.permute.xlu0 %717 }
 0x112   : > { %v584_v11 = vpop.permute.xlu1 %583  ;;  %v729_v32 = vsel %vm719_vm10, %v716_v10, %v718_v30  ;;  %v850_v30 = vld [vmem:[%s3020_s2 + $0x58] sm:$0xff] }
 0x113   : > { %v610_v33 = vsel %vm607_vm9, %v584_v11, %v586_v14  ;;  %1030 = vmatprep.subr.mxu0 %v729_v32  ;;  %882 = vperm.xlu0 %1840, %v844_v5   ;;  %v849_v32 = vld [vmem:[%s3020_s2 + $0x50] sm:$0xff]  ;;  %v794_v5 = vld [vmem:[%s3019_s1 + $0x18] sm:$0xff] }
 0x114   : > { %1723 = vmatpush1.msk.msra.mxu1 %vm2321_vm5, %v610_v33  ;;  %877 = vperm.xlu1 %1841, %v843_v20  }
 0x115   : > { %v714_v34 = vpop.permute.xlu0 %713 }
 0x116   : > { %v580_v35 = vpop.permute.xlu1 %579  ;;  %v728_v36 = vsel %vm719_vm10, %v714_v34, %v716_v10 }
 0x117   : > { %1031 = vmatpush2.msra.mxu0 %v728_v36  ;;  %892 = vperm.xlu0 %1840, %v846_v7   ;;  %v852_v36 = vld [vmem:[%s3020_s2 + $0x68] sm:$0xff]  ;;  %v793_v7 = vld [vmem:[%s3019_s1 + $0x10] sm:$0xff] }
 0x118   : > { %887 = vperm.xlu1 %1841, %v845_v24   ;;  %v801_v24 = vld [vmem:[%s3019_s1 + $0x50] sm:$0xff] }
 0x119   : > { %v582_v37 = vpop.permute.xlu0 %581 }
 0x11a   : > { %v609_v38 = vsel %vm607_vm9, %v580_v35, %v582_v37  ;;  %v710_v39 = vpop.permute.xlu1 %709 }
 0x11b   : > { %1724 = vmatprep.subr.msk.mxu1 %vm2317_vm4, %v609_v38  ;;  %902 = vperm.xlu0 %1840, %v848_v9   ;;  %v851_v38 = vld [vmem:[%s3020_s2 + $0x60] sm:$0xff] }
 0x11c   : > { %897 = vperm.xlu1 %1841, %v847_v27   ;;  %v799_v9 = vld [vmem:[%s3019_s1 + $0x40] sm:$0xff]  ;;  %v806_v27 = vld [vmem:[%s3019_s1 + $0x78] sm:$0xff] }
 0x11d   : > { %v712_v40 = vpop.permute.xlu0 %711 }
 0x11e   : > { %v578_v41 = vpop.permute.xlu1 %577  ;;  %v727_v42 = vsel %vm719_vm10, %v710_v39, %v712_v40 }
 0x11f   : > { %v608_v43 = vsel %vm607_vm9, %v578_v41, %v580_v35  ;;  %1032 = vmatprep.subr.mxu0 %v727_v42  ;;  %912 = vperm.xlu0 %1840, %v850_v30   ;;  %v854_v41 = vld [vmem:[%s3020_s2 + $0x78] sm:$0xff]  ;;  %v809_v30 = vld [vmem:[%s3019_s1 + $0x90] sm:$0xff] }
 0x120   : > { %1725 = vmatpush1.msk.msra.mxu1 %vm2321_vm5, %v608_v43  ;;  %907 = vperm.xlu1 %1841, %v849_v32   ;;  %v853_v43 = vld [vmem:[%s3020_s2 + $0x70] sm:$0xff] }
 0x121   : > { %v708_v44 = vpop.permute.xlu0 %707  ;;  %v813_v32 = vld [vmem:[%s3019_s1 + $0xb0] sm:$0xff] }
 0x122   : > { %v704_v45 = vpop.permute.xlu1 %703  ;;  %v726_v46 = vsel %vm719_vm10, %v708_v44, %v710_v39 }
 0x123   : > { %1033 = vmatpush2.msra.mxu0 %v726_v46  ;;  %922 = vperm.xlu0 %1840, %v852_v36   ;;  %v815_v36 = vld [vmem:[%s3019_s1 + $0xc0] sm:$0xff] }
 0x124   : > { %917 = vperm.xlu1 %1841, %v851_v38   ;;  %v819_v38 = vld [vmem:[%s3019_s1 + $0xe0] sm:$0xff] }
 0x125   : > { %v706_v47 = vpop.permute.xlu0 %705 }
 0x126   : > { %v767_v48 = vpop.permute.xlu1 %766  ;;  %v725_v28 = vsel %vm719_vm10, %v704_v45, %v706_v47 }
 0x127   : > { %1034 = vmatprep.subr.mxu0 %v725_v28  ;;  %932 = vperm.xlu0 %1840, %v854_v41   ;;  %v822_v41 = vld [vmem:[%s3019_s1 + $0xf8] sm:$0xff] }
 0x128   : > { %927 = vperm.xlu1 %1841, %v853_v43   ;;  %v817_v43 = vld [vmem:[%s3019_s1 + $0xd0] sm:$0xff] }
 0x129   : > { %v769_v49 = vpop.permute.xlu0 %768 }
 0x12a   : > { %v702_v50 = vpop.permute.xlu1 %701  ;;  %v780_v51 = vsel %vm770_vm11, %v767_v48, %v769_v49 }
 0x12b   : > { %v724_v52 = vsel %vm719_vm10, %v702_v50, %v704_v45  ;;  %1161 = vmatprep.subr.mxu1 %v780_v51 }
 0x12c   : > { %1035 = vmatpush2.msra.mxu0 %v724_v52 }
 0x12d   : > { %v765_v31 = vpop.permute.xlu0 %764 }
 0x12e   : > { %v698_v53 = vpop.permute.xlu1 %697  ;;  %v779_v54 = vsel %vm770_vm11, %v765_v31, %v767_v48 }
 0x12f   : > { %1162 = vmatpush1.msra.mxu1 %v779_v54 }
 0x131   : > { %v700_v55 = vpop.permute.xlu0 %699 }
 0x132   : > { %v761_v56 = vpop.permute.xlu1 %760  ;;  %v723_v57 = vsel %vm719_vm10, %v698_v53, %v700_v55 }
 0x133   : > { %1036 = vmatprep.subr.mxu0 %v723_v57 }
 0x135   : > { %v763_v0 = vpop.permute.xlu0 %762 }
 0x136   : > { %v696_v2 = vpop.permute.xlu1 %695  ;;  %v778_v58 = vsel %vm770_vm11, %v761_v56, %v763_v0 }
 0x137   : > { %v722_v59 = vsel %vm719_vm10, %v696_v2, %v698_v53  ;;  %1163 = vmatprep.subr.mxu1 %v778_v58 }
 0x138   : > { %1037 = vmatpush2.msra.mxu0 %v722_v59 }
 0x139   : > { %v759_v1 = vpop.permute.xlu0 %758 }
 0x13a   : > { %v692_v62 = vpop.permute.xlu1 %691  ;;  %v777_v3 = vsel %vm770_vm11, %v759_v1, %v761_v56 }
 0x13b   : > { %1164 = vmatpush1.msra.mxu1 %v777_v3 }
 0x13d   : > { %v694_v4 = vpop.permute.xlu0 %693 }
 0x13e   : > { %v755_v17 = vpop.permute.xlu1 %754  ;;  %v721_v18 = vsel %vm719_vm10, %v692_v62, %v694_v4  ;;  %v795_v4 = vld [vmem:[%s3019_s1 + $0x20] sm:$0xff] }
 0x13f   : > { %1038 = vmatprep.subr.mxu0 %v721_v18 }
 0x141   : > { %v757_v12 = vpop.permute.xlu0 %756 }
 0x142   : > { %v690_v6 = vpop.permute.xlu1 %689  ;;  %v776_v13 = vsel %vm770_vm11, %v755_v17, %v757_v12  ;;  %v798_v12 = vld [vmem:[%s3019_s1 + $0x38] sm:$0xff] }
 0x143   : > { %v720_v21 = vsel %vm719_vm10, %v690_v6, %v692_v62  ;;  %1165 = vmatprep.subr.mxu1 %v776_v13 }
 0x144   : > { %1039 = vmatpush2.msra.mxu0 %v720_v21  ;;  %v797_v21 = vld [vmem:[%s3019_s1 + $0x30] sm:$0xff] }
 0x145   : > { %v753_v23 = vpop.permute.xlu0 %752 }
 0x146   : > { %v421_v26 = vpop.permute.xlu1 %420  ;;  %v775_v8 = vsel %vm770_vm11, %v753_v23, %v755_v17 }
 0x147   : > { %1166 = vmatpush1.msra.mxu1 %v775_v8  ;;  %v804_v8 = vld [vmem:[%s3019_s1 + $0x68] sm:$0xff] }
 0x149   : > { %v423_v14 = vpop.permute.xlu0 %422 }
 0x14a   : > { %v434_v29 = vsel %vm424_vm1, %v421_v26, %v423_v14  ;;  %v749_v10 = vpop.permute.xlu1 %748  ;;  %v807_v14 = vld [vmem:[%s3019_s1 + $0x80] sm:$0xff] }
 0x14b   : > { %1708 = vmatprep.subr.msk.mxu0 %vm2299_vm0, %v434_v29  ;;  %v802_v29 = vld [vmem:[%s3019_s1 + $0x58] sm:$0xff] }
 0x14d   : > { %v751_v11 = vpop.permute.xlu0 %750 }
 0x14e   : > { %v419_v33 = vpop.permute.xlu1 %418  ;;  %v774_v34 = vsel %vm770_vm11, %v749_v10, %v751_v11  ;;  %v805_v11 = vld [vmem:[%s3019_s1 + $0x70] sm:$0xff] }
 0x14f   : > { %v433_v35 = vsel %vm424_vm1, %v419_v33, %v421_v26  ;;  %1167 = vmatprep.subr.mxu1 %v774_v34  ;;  %v800_v26 = vld [vmem:[%s3019_s1 + $0x48] sm:$0xff] }
 0x150   : > { %1709 = vmatpush2.msk.msra.mxu0 %vm2303_vm2, %v433_v35  ;;  %v812_v33 = vld [vmem:[%s3019_s1 + $0xa8] sm:$0xff] }
 0x151   : > { %v747_v37 = vpop.permute.xlu0 %746  ;;  %v808_v34 = vld [vmem:[%s3019_s1 + $0x88] sm:$0xff] }
 0x152   : > { %v415_v39 = vpop.permute.xlu1 %414  ;;  %v773_v40 = vsel %vm770_vm11, %v747_v37, %v749_v10  ;;  %v810_v10 = vld [vmem:[%s3019_s1 + $0x98] sm:$0xff]  ;;  %v816_v35 = vld [vmem:[%s3019_s1 + $0xc8] sm:$0xff]  ;;  %v811_v37 = vld [vmem:[%s3019_s1 + $0xa0] sm:$0xff] }
 0x153   : > { %1168 = vmatpush1.msra.mxu1 %v773_v40  ;;  %v814_v40 = vld [vmem:[%s3019_s1 + $0xb8] sm:$0xff] }
 0x155   : > { %v417_v42 = vpop.permute.xlu0 %416 }
 0x156   : > { %v432_v44 = vsel %vm424_vm1, %v415_v39, %v417_v42  ;;  %v743_v45 = vpop.permute.xlu1 %742  ;;  %v821_v42 = vld [vmem:[%s3019_s1 + $0xf0] sm:$0xff] }
 0x157   : > { %1710 = vmatprep.subr.msk.mxu0 %vm2299_vm0, %v432_v44  ;;  %v825_v44 = vld [vmem:[%s3019_s1 + $0x110] sm:$0xff] }
 0x159   : > { %v745_v46 = vpop.permute.xlu0 %744 }
 0x15a   : > { %v413_v47 = vpop.permute.xlu1 %412  ;;  %v772_v48 = vsel %vm770_vm11, %v743_v45, %v745_v46  ;;  %v820_v46 = vld [vmem:[%s3019_s1 + $0xe8] sm:$0xff] }
 0x15b   : > { %v431_v28 = vsel %vm424_vm1, %v413_v47, %v415_v39  ;;  %1169 = vmatprep.subr.mxu1 %v772_v48  ;;  %v818_v39 = vld [vmem:[%s3019_s1 + $0xd8] sm:$0xff]  ;;  %v828_v47 = vld [vmem:[%s3019_s1 + $0x128] sm:$0xff]  ;;  %v827_v48 = vld [vmem:[%s3019_s1 + $0x120] sm:$0xff] }
 0x15c   : > { %1711 = vmatpush2.msk.msra.mxu0 %vm2303_vm2, %v431_v28  ;;  %v823_v28 = vld [vmem:[%s3019_s1 + $0x100] sm:$0xff] }
 0x15d   : > { %v741_v49 = vpop.permute.xlu0 %740 }
 0x15e   : > { %v409_v50 = vpop.permute.xlu1 %408  ;;  %v771_v51 = vsel %vm770_vm11, %v741_v49, %v743_v45  ;;  %v824_v45 = vld [vmem:[%s3019_s1 + $0x108] sm:$0xff]  ;;  %v831_v49 = vld [vmem:[%s3019_s1 + $0x140] sm:$0xff] }
 0x15f   : > { %1170 = vmatpush1.msra.mxu1 %v771_v51  ;;  %v826_v51 = vld [vmem:[%s3019_s1 + $0x118] sm:$0xff] }
 0x161   : > { %v411_v52 = vpop.permute.xlu0 %410 }
 0x162   : > { %v430_v31 = vsel %vm424_vm1, %v409_v50, %v411_v52  ;;  %v543_v53 = vpop.permute.xlu1 %542  ;;  %v834_v52 = vld [vmem:[%s3019_s1 + $0x158] sm:$0xff] }
 0x163   : > { %1712 = vmatprep.subr.msk.mxu0 %vm2299_vm0, %v430_v31  ;;  %v833_v31 = vld [vmem:[%s3019_s1 + $0x150] sm:$0xff] }
 0x165   : > { %v545_v54 = vpop.permute.xlu0 %544 }
 0x166   : > { %v556_v55 = vsel %vm546_vm7, %v543_v53, %v545_v54  ;;  %v407_v56 = vpop.permute.xlu1 %406  ;;  %v837_v54 = vld [vmem:[%s3019_s1 + $0x170] sm:$0xff] }
 0x167   : > { %v429_v57 = vsel %vm424_vm1, %v407_v56, %v409_v50  ;;  %1726 = vmatprep.subr.msk.mxu1 %vm2299_vm0, %v556_v55  ;;  %v830_v50 = vld [vmem:[%s3019_s1 + $0x138] sm:$0xff]  ;;  %v836_v55 = vld [vmem:[%s3019_s1 + $0x168] sm:$0xff] }
 0x168   : > { %1713 = vmatpush2.msk.msra.mxu0 %vm2303_vm2, %v429_v57  ;;  %v832_v56 = vld [vmem:[%s3019_s1 + $0x148] sm:$0xff]  ;;  %v835_v57 = vld [vmem:[%s3019_s1 + $0x160] sm:$0xff] }
 0x169   : > { %v541_v0 = vpop.permute.xlu0 %540 }
 0x16a   : > { %v555_v2 = vsel %vm546_vm7, %v541_v0, %v543_v53  ;;  %v403_v58 = vpop.permute.xlu1 %402  ;;  %v829_v53 = vld [vmem:[%s3019_s1 + $0x130] sm:$0xff]  ;;  %v838_v0 = vld [vmem:[%s3019_s1 + $0x178] sm:$0xff] }
 0x16b   : > { %1727 = vmatpush1.msk.msra.mxu1 %vm2303_vm2, %v555_v2 }
 0x16d   : > { %v405_v59 = vpop.permute.xlu0 %404 }
 0x16e   : > { %v428_v1 = vsel %vm424_vm1, %v403_v58, %v405_v59  ;;  %v537_v60 = vpop.permute.xlu1 %536 }
 0x16f   : > { %1714 = vmatprep.subr.msk.mxu0 %vm2299_vm0, %v428_v1 }
 0x171   : > { %v539_v61 = vpop.permute.xlu0 %538 }
 0x172   : > { %v554_v62 = vsel %vm546_vm7, %v537_v60, %v539_v61  ;;  %v401_v3 = vpop.permute.xlu1 %400 }
 0x173   : > { %v427_v15 = vsel %vm424_vm1, %v401_v3, %v403_v58  ;;  %1728 = vmatprep.subr.msk.mxu1 %vm2299_vm0, %v554_v62 }
 0x174   : > { %1715 = vmatpush2.msk.msra.mxu0 %vm2303_vm2, %v427_v15 }
 0x175   : > { %1049 = vmatmul.mubr.f32.vlgmr.msra.gmra.mxu0 %v791_v63  ;;  %v535_v16 = vpop.permute.xlu0 %534 }
 0x176   : > { %v553_v17 = vsel %vm546_vm7, %v535_v16, %v537_v60  ;;  %v531_v18 = vpop.permute.xlu1 %530  ;;  %1054 = vmatprep.mubr.f32.mxu0 %v795_v4 }
 0x177   : > { %1729 = vmatpush1.msk.msra.mxu1 %vm2303_vm2, %v553_v17 }
 0x179   : > { %1055 = vmatmul.mubr.f32.gmra.mxu0 %v794_v5  ;;  %v533_v20 = vpop.permute.xlu0 %532 }
 0x17a   : > { %v552_v6 = vsel %vm546_vm7, %v531_v18, %v533_v20  ;;  %v529_v13 = vpop.permute.xlu1 %528  ;;  %1060 = vmatprep.mubr.f32.mxu0 %v798_v12 }
 0x17b   : > { %v551_v23 = vsel %vm546_vm7, %v529_v13, %v531_v18  ;;  %1730 = vmatprep.subr.msk.mxu1 %vm2299_vm0, %v552_v6 }
 0x17c   : > { %1731 = vmatpush1.msk.msra.mxu1 %vm2303_vm2, %v551_v23 }
 0x17d   : > { %1061 = vmatmul.mubr.f32.gmra.mxu0 %v797_v21  ;;  %1732 = vmatmul.mubr.msk.f32.vlgmr.msra.gmra.mxu1 %vm935_vm12, %v793_v7 }
 0x17e   : > { %1066 = vmatprep.mubr.f32.mxu0 %v801_v24  ;;  %1215 = vmatprep.mubr.f32.mxu1 %v2070_v19 }
 0x181   : > { %1067 = vmatmul.mubr.f32.gmra.mxu0 %v800_v26  ;;  %1733 = vmatmul.mubr.msk.f32.gmra.mxu1 %vm935_vm12, %v796_v22 }
 0x182   : > { %1072 = vmatprep.mubr.f32.mxu0 %v804_v8  ;;  %1221 = vmatprep.mubr.f32.mxu1 %v2070_v19 }
 0x185   : > { %1073 = vmatmul.mubr.f32.gmra.mxu0 %v803_v25  ;;  %1734 = vmatmul.mubr.msk.f32.gmra.mxu1 %vm935_vm12, %v799_v9 }
 0x186   : > { %1078 = vmatprep.mubr.f32.mxu0 %v807_v14  ;;  %1227 = vmatprep.mubr.f32.mxu1 %v2070_v19  ;;  %v858_v61 = vpop.permute.xlu0 %857 }
 0x187   : > { %v863_v1 = vpop.permute.xlu1 %862 }
 0x189   : > { %1079 = vmatmul.mubr.f32.gmra.mxu0 %v806_v27  ;;  %1735 = vmatmul.mubr.msk.f32.gmra.mxu1 %vm935_vm12, %v802_v29 }
 0x18a   : > { %1084 = vmatprep.mubr.f32.mxu0 %v810_v10  ;;  %1233 = vmatprep.mubr.f32.mxu1 %v2070_v19  ;;  %v873_v22 = vpop.permute.xlu0 %872 }
 0x18b   : > { %v868_v16 = vpop.permute.xlu1 %867 }
 0x18d   : > { %1085 = vmatmul.mubr.f32.gmra.mxu0 %v809_v30  ;;  %1736 = vmatmul.mubr.msk.f32.gmra.mxu1 %vm935_vm12, %v805_v11 }
 0x18e   : > { %1090 = vmatprep.mubr.f32.mxu0 %v813_v32  ;;  %1239 = vmatprep.mubr.f32.mxu1 %v2070_v19 }
 0x18f   : > { %v878_v11 = vpop.permute.xlu1 %877 }
 0x191   : > { %1091 = vmatmul.mubr.f32.gmra.mxu0 %v812_v33  ;;  %1737 = vmatmul.mubr.msk.f32.gmra.mxu1 %vm935_vm12, %v808_v34 }
 0x192   : > { %1096 = vmatprep.mubr.f32.mxu0 %v816_v35  ;;  %1245 = vmatprep.mubr.f32.mxu1 %v2070_v19 }
 0x195   : > { %1097 = vmatmul.mubr.f32.gmra.mxu0 %v815_v36  ;;  %1738 = vmatmul.mubr.msk.f32.gmra.mxu1 %vm935_vm12, %v811_v37 }
 0x196   : > { %1102 = vmatprep.mubr.f32.mxu0 %v819_v38  ;;  %1251 = vmatprep.mubr.f32.mxu1 %v2070_v19 }
 0x199   : > { %1103 = vmatmul.mubr.f32.gmra.mxu0 %v818_v39  ;;  %1739 = vmatmul.mubr.msk.f32.gmra.mxu1 %vm935_vm12, %v814_v40 }
 0x19a   : > { %1108 = vmatprep.mubr.f32.mxu0 %v822_v41  ;;  %1257 = vmatprep.mubr.f32.mxu1 %v2070_v19 }
 0x19d   : > { %1109 = vmatmul.mubr.f32.gmra.mxu0 %v821_v42  ;;  %1740 = vmatmul.mubr.msk.f32.gmra.mxu1 %vm935_vm12, %v817_v43  ;;  %v883_v42 = vpop.permute.xlu0 %882 }
 0x19e   : > { %1114 = vmatprep.mubr.f32.mxu0 %v825_v44  ;;  %1263 = vmatprep.mubr.f32.mxu1 %v2070_v19 }
 0x1a1   : > { %1115 = vmatmul.mubr.f32.gmra.mxu0 %v824_v45  ;;  %1741 = vmatmul.mubr.msk.f32.gmra.mxu1 %vm935_vm12, %v820_v46 }
 0x1a2   : > { %1120 = vmatprep.mubr.f32.mxu0 %v828_v47  ;;  %1269 = vmatprep.mubr.f32.mxu1 %v2070_v19 }
 0x1a5   : > { %1121 = vmatmul.mubr.f32.gmra.mxu0 %v827_v48  ;;  %1742 = vmatmul.mubr.msk.f32.gmra.mxu1 %vm935_vm12, %v823_v28 }
 0x1a6   : > { %1126 = vmatprep.mubr.f32.mxu0 %v831_v49  ;;  %1275 = vmatprep.mubr.f32.mxu1 %v2070_v19 }
 0x1a9   : > { %1127 = vmatmul.mubr.f32.gmra.mxu0 %v830_v50  ;;  %1743 = vmatmul.mubr.msk.f32.gmra.mxu1 %vm935_vm12, %v826_v51  ;;  %v888_v51 = vpop.permute.xlu1 %887 }
 0x1aa   : > { %1132 = vmatprep.mubr.f32.mxu0 %v834_v52  ;;  %1281 = vmatprep.mubr.f32.mxu1 %v2070_v19 }
 0x1ad   : > { %1133 = vmatmul.mubr.f32.gmra.mxu0 %v833_v31  ;;  %1744 = vmatmul.mubr.msk.f32.gmra.mxu1 %vm935_vm12, %v829_v53 }
 0x1ae   : > { %1138 = vmatprep.mubr.f32.mxu0 %v837_v54  ;;  %1287 = vmatprep.mubr.f32.mxu1 %v2070_v19 }
 0x1b1   : > { %1139 = vmatmul.mubr.f32.gmra.mxu0 %v836_v55  ;;  %1745 = vmatmul.mubr.msk.f32.gmra.mxu1 %vm935_vm12, %v832_v56 }
 0x1b2   : > { %1293 = vmatprep.mubr.f32.mxu1 %v2070_v19 }
 0x1b5   : > { %1746 = vmatmul.mubr.msk.f32.gmra.mxu1 %vm935_vm12, %v835_v57 }
 0x1b6   : > { %1299 = vmatprep.mubr.f32.mxu1 %v2070_v19 }
 0x1b9   : > { %1747 = vmatmul.mubr.msk.f32.gmra.mxu1 %vm935_vm12, %v838_v0 }
 0x235   : > { %v1050_v2 = vpop.f32.mrf.mxu0 }
 0x236   : > { %v1051_v63 = vadd.f32 %v1050_v2, %v858_v61 }
 0x237   : > { %v1052_v58 = vpop.f32.mrf.mxu0 }
 0x238   : > { %v1053_v5 = vadd.f32 %v1052_v58, %v858_v61 }
 0x239   : > { %v1056_v59 = vpop.f32.mrf.mxu0 }
 0x23a   : > { %v1057_v17 = vadd.f32 %v1056_v59, %v863_v1 }
 0x23b   : > { %v1058_v60 = vpop.f32.mrf.mxu0 }
 0x23c   : > { %v1059_v7 = vadd.f32 %v1058_v60, %v863_v1 }
 0x23d   : > { %v1062_v62 = vpop.f32.mrf.mxu0  ;;  %v1211_v3 = vpop.f32.mrf.mxu1 }
 0x23e   : > { %v1212_v12 = vadd.f32 %v1211_v3, %v1051_v63  ;;  %v1063_v21 = vadd.f32 %v1062_v62, %v868_v16 }
 0x23f   : > { %v1064_v15 = vpop.f32.mrf.mxu0  ;;  %v1213_v4 = vpop.f32.mrf.mxu1 }
 0x240   : > { %v1214_v13 = vadd.f32 %v1213_v4, %v1053_v5  ;;  %v1748_v8 = vmul.f32 -1.442695, %v1212_v12  ;;  %v1065_v14 = vadd.f32 %v1064_v15, %v868_v16 }
 0x241   : > { %v1068_v19 = vpop.f32.mrf.mxu0  ;;  %v1217_v18 = vpop.f32.mrf.mxu1 }
 0x242   : > { %v1218_v23 = vadd.f32 %v1217_v18, %v1057_v17  ;;  %v1069_v25 = vadd.f32 %v1068_v19, %v873_v22  ;;  %v1749_v10 = vmul.f32 -1.442695, %v1214_v13  ;;  %1842 = vpow2.f32 %v1748_v8  ;;  %v893_v17 = vpop.permute.xlu0 %892 }
 0x243   : > { %v1070_v20 = vpop.f32.mrf.mxu0  ;;  %v1219_v6 = vpop.f32.mrf.mxu1 }
 0x244   : > { %v1220_v9 = vadd.f32 %v1219_v6, %v1059_v7  ;;  %v1750_v32 = vmul.f32 -1.442695, %v1218_v23  ;;  %1844 = vpow2.f32 %v1749_v10  ;;  %v1071_v57 = vadd.f32 %v1070_v20, %v873_v22 }
 0x245   : > { %v1074_v24 = vpop.f32.mrf.mxu0  ;;  %v1223_v26 = vpop.f32.mrf.mxu1 }
 0x246   : > { %v1224_v30 = vadd.f32 %v1223_v26, %v1063_v21  ;;  %v1075_v36 = vadd.f32 %v1074_v24, %v878_v11  ;;  %v1751_v37 = vmul.f32 -1.442695, %v1220_v9  ;;  %1846 = vpow2.f32 %v1750_v32  ;;  %v898_v9 = vpop.permute.xlu1 %897 }
 0x247   : > { %v1076_v27 = vpop.f32.mrf.mxu0  ;;  %v1225_v29 = vpop.f32.mrf.mxu1 }
 0x248   : > { %v1226_v33 = vadd.f32 %v1225_v29, %v1065_v14  ;;  %v1752_v41 = vmul.f32 -1.442695, %v1224_v30  ;;  %1848 = vpow2.f32 %v1751_v37  ;;  %v1077_v48 = vadd.f32 %v1076_v27, %v878_v11 }
 0x249   : > { %v1080_v34 = vpop.f32.mrf.mxu0  ;;  %v1229_v35 = vpop.f32.mrf.mxu1 }
 0x24a   : > { %v1230_v38 = vadd.f32 %v1229_v35, %v1069_v25  ;;  %v1753_v43 = vmul.f32 -1.442695, %v1226_v33  ;;  %v1081_v46 = vadd.f32 %v1080_v34, %v883_v42  ;;  %1850 = vpow2.f32 %v1752_v41 }
 0x24b   : > { %v1082_v39 = vpop.f32.mrf.mxu0  ;;  %v1231_v40 = vpop.f32.mrf.mxu1 }
 0x24c   : > { %v1754_v28 = vmul.f32 -1.442695, %v1230_v38  ;;  %1852 = vpow2.f32 %v1753_v43  ;;  %v1083_v0 = vadd.f32 %v1082_v39, %v883_v42  ;;  %v1232_v1 = vadd.f32 %v1231_v40, %v1071_v57 }
 0x24d   : > { %v1086_v44 = vpop.f32.mrf.mxu0  ;;  %v1235_v45 = vpop.f32.mrf.mxu1 }
 0x24e   : > { %v1236_v47 = vadd.f32 %v1235_v45, %v1075_v36  ;;  %v1087_v54 = vadd.f32 %v1086_v44, %v888_v51  ;;  %1854 = vpow2.f32 %v1754_v28  ;;  %v1755_v12 = vmul.f32 -1.442695, %v1232_v1 }
 0x24f   : > { %v1088_v49 = vpop.f32.mrf.mxu0  ;;  %v1237_v50 = vpop.f32.mrf.mxu1 }
 0x250   : > { %v1238_v52 = vadd.f32 %v1237_v50, %v1077_v48  ;;  %v1756_v55 = vmul.f32 -1.442695, %v1236_v47  ;;  %v1843_v16 = vpop.eup %1842  ;;  %v1089_v19 = vadd.f32 %v1088_v49, %v888_v51 }
 0x251   : > { %v1092_v31 = vpop.f32.mrf.mxu0  ;;  %v1241_v53 = vpop.f32.mrf.mxu1  ;;  %v1378_v24 = vadd.f32 1.0, %v1843_v16 }
 0x252   : > { %v1242_v56 = vadd.f32 %v1241_v53, %v1081_v46  ;;  %v1757_v59 = vmul.f32 -1.442695, %v1238_v52  ;;  %1856 = vpow2.f32 %v1756_v55  ;;  %v1845_v5 = vpop.eup %1844  ;;  %v1093_v21 = vadd.f32 %v1092_v31, %v893_v17  ;;  %v903_v46 = vpop.permute.xlu0 %902 }
 0x253   : > { %v1094_v2 = vpop.f32.mrf.mxu0  ;;  %v1243_v58 = vpop.f32.mrf.mxu1  ;;  %v1379_v25 = vadd.f32 1.0, %v1845_v5 }
 0x254   : > { %v1244_v60 = vadd.f32 %v1243_v58, %v1083_v0  ;;  %v1758_v3 = vmul.f32 -1.442695, %v1242_v56  ;;  %1858 = vpow2.f32 %v1757_v59  ;;  %v1847_v13 = vpop.eup %1846  ;;  %v1095_v32 = vadd.f32 %v1094_v2, %v893_v17  ;;  %v908_v58 = vpop.permute.xlu1 %907 }
 0x255   : > { %v1098_v61 = vpop.f32.mrf.mxu0  ;;  %v1247_v62 = vpop.f32.mrf.mxu1  ;;  %v1380_v27 = vadd.f32 1.0, %v1847_v13 }
 0x256   : > { %v1248_v63 = vadd.f32 %v1247_v62, %v1087_v54  ;;  %v1759_v18 = vmul.f32 -1.442695, %v1244_v60  ;;  %1860 = vpow2.f32 %v1758_v3  ;;  %v1849_v8 = vpop.eup %1848  ;;  %v1099_v29 = vadd.f32 %v1098_v61, %v898_v9 }
 0x257   : > { %v1100_v15 = vpop.f32.mrf.mxu0  ;;  %v1249_v4 = vpop.f32.mrf.mxu1  ;;  %v1381_v35 = vadd.f32 1.0, %v1849_v8 }
 0x258   : > { %v1760_v7 = vmul.f32 -1.442695, %v1248_v63  ;;  %v1250_v23 = vadd.f32 %v1249_v4, %v1089_v19  ;;  %1862 = vpow2.f32 %v1759_v18  ;;  %v1851_v14 = vpop.eup %1850  ;;  %v1101_v42 = vadd.f32 %v1100_v15, %v898_v9 }
 0x259   : > { %v1104_v20 = vpop.f32.mrf.mxu0  ;;  %v1253_v6 = vpop.f32.mrf.mxu1  ;;  %1864 = vpow2.f32 %v1755_v12  ;;  %v1382_v39 = vadd.f32 1.0, %v1851_v14 }
 0x25a   : > { %v1853_v11 = vpop.eup %1852  ;;  %1866 = vpow2.f32 %v1760_v7  ;;  %v1761_v33 = vmul.f32 -1.442695, %v1250_v23  ;;  %v1254_v34 = vadd.f32 %v1253_v6, %v1093_v21  ;;  %v1105_v49 = vadd.f32 %v1104_v20, %v903_v46  ;;  %v913_v12 = vpop.permute.xlu0 %912 }
 0x25b   : > { %v1106_v26 = vpop.f32.mrf.mxu0  ;;  %v1255_v22 = vpop.f32.mrf.mxu1  ;;  %1868 = vrcp.f32 %v1378_v24  ;;  %v1383_v41 = vadd.f32 1.0, %v1853_v11 }
 0x25c   : > { %v1855_v38 = vpop.eup %1854  ;;  %1870 = vrcp.f32 %v1379_v25  ;;  %v1256_v40 = vadd.f32 %v1255_v22, %v1095_v32  ;;  %v1762_v47 = vmul.f32 -1.442695, %v1254_v34  ;;  %v1107_v54 = vadd.f32 %v1106_v26, %v903_v46  ;;  %v918_v26 = vpop.permute.xlu1 %917 }
 0x25d   : > { %v1110_v10 = vpop.f32.mrf.mxu0  ;;  %v1259_v30 = vpop.f32.mrf.mxu1  ;;  %1872 = vrcp.f32 %v1380_v27  ;;  %v1384_v28 = vadd.f32 1.0, %v1855_v38 }
 0x25e   : > { %v1260_v43 = vadd.f32 %v1259_v30, %v1099_v29  ;;  %1874 = vpow2.f32 %v1761_v33  ;;  %v1763_v31 = vmul.f32 -1.442695, %v1256_v40  ;;  %v1111_v1 = vadd.f32 %v1110_v10, %v908_v58 }
 0x25f   : > { %v1112_v36 = vpop.f32.mrf.mxu0  ;;  %v1261_v37 = vpop.f32.mrf.mxu1  ;;  %1876 = vrcp.f32 %v1381_v35 }
 0x260   : > { %v1857_v48 = vpop.eup %1856  ;;  %v1262_v50 = vadd.f32 %v1261_v37, %v1101_v42  ;;  %1878 = vrcp.f32 %v1382_v39  ;;  %v1764_v55 = vmul.f32 -1.442695, %v1260_v43  ;;  %v1113_v20 = vadd.f32 %v1112_v36, %v908_v58  ;;  %v923_v36 = vpop.permute.xlu0 %922 }
 0x261   : > { %v2869_v44 = vpop.f32.mrf.mxu0  ;;  %v1265_v45 = vpop.f32.mrf.mxu1  ;;  %1880 = vrcp.f32 %v1383_v41  ;;  %v1386_v2 = vadd.f32 1.0, %v1857_v48 }
 0x262   : > { %v1859_v53 = vpop.eup %1858  ;;  %v1266_v56 = vadd.f32 %v1265_v45, %v1105_v49  ;;  %1882 = vpow2.f32 %v1762_v47  ;;  %v1765_v60 = vmul.f32 -1.442695, %v1262_v50  ;;  %v1117_v30 = vadd.f32 %v2869_v44, %v913_v12 }
 0x263   : > { %v2871_v51 = vpop.f32.mrf.mxu0  ;;  %v1267_v52 = vpop.f32.mrf.mxu1  ;;  %1884 = vrcp.f32 %v1384_v28  ;;  %v1387_v63 = vadd.f32 1.0, %v1859_v53 }
 0x264   : > { %v1861_v59 = vpop.eup %1860  ;;  %v1268_v61 = vadd.f32 %v1267_v52, %v1107_v54  ;;  %1886 = vpow2.f32 %v1763_v31  ;;  %v1766_v4 = vmul.f32 -1.442695, %v1266_v56  ;;  %v1119_v46 = vadd.f32 %v2871_v51, %v913_v12  ;;  %v928_v52 = vpop.permute.xlu1 %927 }
 0x265   : > { %v1122_v57 = vpop.f32.mrf.mxu0  ;;  %v1271_v0 = vpop.f32.mrf.mxu1  ;;  %1888 = vpow2.f32 %v1764_v55  ;;  %v1388_v5 = vadd.f32 1.0, %v1861_v59 }
 0x266   : > { %v1863_v15 = vpop.eup %1862  ;;  %v1272_v16 = vadd.f32 %v1271_v0, %v1111_v1  ;;  %1890 = vrcp.f32 %v1386_v2  ;;  %v1767_v13 = vmul.f32 -1.442695, %v1268_v61  ;;  %v1123_v25 = vadd.f32 %v1122_v57, %v918_v26 }
 0x267   : > { %v1124_v62 = vpop.f32.mrf.mxu0  ;;  %v1273_v3 = vpop.f32.mrf.mxu1  ;;  %1892 = vpow2.f32 %v1765_v60  ;;  %v1389_v24 = vadd.f32 1.0, %v1863_v15 }
 0x268   : > { %v2873_v18 = vpop.eup %1864  ;;  %1894 = vrcp.f32 %v1387_v63  ;;  %v1274_v22 = vadd.f32 %v1273_v3, %v1113_v20  ;;  %v1768_v9 = vmul.f32 -1.442695, %v1272_v16  ;;  %v1125_v32 = vadd.f32 %v1124_v62, %v918_v26  ;;  %v933_v62 = vpop.permute.xlu0 %932 }
 0x269   : > { %v1128_v17 = vpop.f32.mrf.mxu0  ;;  %v1277_v19 = vpop.f32.mrf.mxu1  ;;  %1896 = vpow2.f32 %v1766_v4 }
 0x26a   : > { %v1867_v6 = vpop.eup %1866  ;;  %1898 = vrcp.f32 %v1388_v5  ;;  %v1769_v37 = vmul.f32 -1.442695, %v1274_v22  ;;  %v1278_v38 = vadd.f32 %v1277_v19, %v1117_v30  ;;  %v1129_v41 = vadd.f32 %v1128_v17, %v923_v36 }
 0x26b   : > { %v1130_v21 = vpop.f32.mrf.mxu0  ;;  %v1279_v7 = vpop.f32.mrf.mxu1  ;;  %v1390_v10 = vadd.f32 1.0, %v1867_v6 }
 0x26c   : > { %v2875_v23 = vpop.eup %1868  ;;  %1900 = vpow2.f32 %v1767_v13  ;;  %v1131_v48 = vadd.f32 %v1130_v21, %v923_v36  ;;  %v1770_v31 = vmul.f32 -1.442695, %v1278_v38  ;;  %v1280_v53 = vadd.f32 %v1279_v7, %v1119_v46 }
 0x26d   : > { %v2877_v8 = vpop.eup %1870  ;;  %v1134_v14 = vpop.f32.mrf.mxu0  ;;  %1902 = vrcp.f32 %v1389_v24  ;;  %v1385_v7 = vadd.f32 1.0, %v2873_v18 }
 0x26e   : > { %v1283_v27 = vpop.f32.mrf.mxu1  ;;  %v2879_v29 = vpop.eup %1872  ;;  %1904 = vpow2.f32 %v1768_v9  ;;  %v1135_v56 = vadd.f32 %v1134_v14, %v928_v52  ;;  %v1771_v3 = vmul.f32 -1.442695, %v1280_v53 }
 0x26f   : > { %v1875_v11 = vpop.eup %1874  ;;  %v1284_v33 = vadd.f32 %v1283_v27, %v1123_v25  ;;  %v1136_v39 = vpop.f32.mrf.mxu0  ;;  %1906 = vrcp.f32 %v1390_v10  ;;  %v1458_v25 = vld [vmem:[%s2895_s14] sm:$0xff]  ;;  %v1459_v10 = vld [vmem:[%s2895_s14 + $0x8] sm:$0xff] }
 0x270   : > { %v1285_v34 = vpop.f32.mrf.mxu1  ;;  %v2882_v35 = vpop.eup %1876  ;;  %v1391_v44 = vadd.f32 1.0, %v1875_v11  ;;  %v1137_v59 = vadd.f32 %v1136_v39, %v928_v52 }
 0x271   : > { %v2884_v40 = vpop.eup %1878  ;;  %v1286_v42 = vadd.f32 %v1285_v34, %v1125_v32  ;;  %1908 = vtanh.f32 %v1284_v33  ;;  %v1140_v54 = vpop.f32.mrf.mxu0  ;;  %v1460_v34 = vld [vmem:[%s2895_s14 + $0x10] sm:$0xff] }
 0x272   : > { %v1289_v43 = vpop.f32.mrf.mxu1  ;;  %v2886_v45 = vpop.eup %1880  ;;  %1910 = vpow2.f32 %v1769_v37  ;;  %v1141_v4 = vadd.f32 %v1140_v54, %v933_v62 }
 0x273   : > { %v1883_v47 = vpop.eup %1882  ;;  %v1290_v28 = vadd.f32 %v1289_v43, %v1129_v41  ;;  %1912 = vtanh.f32 %v1286_v42  ;;  %v1142_v63 = vpop.f32.mrf.mxu0  ;;  %v1461_v43 = vld [vmem:[%s2895_s14 + $0x18] sm:$0xff] }
 0x274   : > { %v1291_v49 = vpop.f32.mrf.mxu1  ;;  %v2889_v50 = vpop.eup %1884  ;;  %1914 = vrcp.f32 %v1391_v44  ;;  %v1392_v51 = vadd.f32 1.0, %v1883_v47  ;;  %v1143_v20 = vadd.f32 %v1142_v63, %v933_v62  ;;  %v1465_v63 = vld [vmem:[%s2895_s14 + $0x38] sm:$0xff] }
 0x275   : > { %v1887_v55 = vpop.eup %1886  ;;  %v1292_v57 = vadd.f32 %v1291_v49, %v1131_v48  ;;  %1916 = vtanh.f32 %v1290_v28  ;;  %v1462_v28 = vld [vmem:[%s2895_s14 + $0x20] sm:$0xff] }
 0x276   : > { %v1295_v0 = vpop.f32.mrf.mxu1  ;;  %v1889_v2 = vpop.eup %1888  ;;  %1918 = vpow2.f32 %v1770_v31  ;;  %v1393_v5 = vadd.f32 1.0, %v1887_v55 }
 0x277   : > { %v1891_v58 = vpop.eup %1890  ;;  %v1296_v1 = vadd.f32 %v1295_v0, %v1135_v56  ;;  %1920 = vtanh.f32 %v1292_v57  ;;  %v1394_v27 = vadd.f32 1.0, %v1889_v2  ;;  %v1463_v56 = vld [vmem:[%s2895_s14 + $0x28] sm:$0xff] }
 0x278   : > { %v1297_v60 = vpop.f32.mrf.mxu1  ;;  %v1893_v61 = vpop.eup %1892  ;;  %1922 = vrcp.f32 %v1392_v51  ;;  %v1466_v30 = vmul.f32 %v1891_v58, %v1458_v25 }
 0x279   : > { %v1895_v15 = vpop.eup %1894  ;;  %v1298_v16 = vadd.f32 %v1297_v60, %v1137_v59  ;;  %1924 = vtanh.f32 %v1296_v1  ;;  %v1395_v33 = vadd.f32 1.0, %v1893_v61  ;;  %v1464_v59 = vld [vmem:[%s2895_s14 + $0x30] sm:$0xff] }
 0x27a   : > { %v1301_v17 = vpop.f32.mrf.mxu1  ;;  %v1897_v19 = vpop.eup %1896  ;;  %1926 = vpow2.f32 %v1771_v3  ;;  %v1467_v38 = vmul.f32 %v1895_v15, %v1459_v10 }
 0x27b   : > { %v1899_v12 = vpop.eup %1898  ;;  %v1302_v6 = vadd.f32 %v1301_v17, %v1141_v4  ;;  %1928 = vtanh.f32 %v1298_v16  ;;  %v1396_v42 = vadd.f32 1.0, %v1897_v19 }
 0x27c   : > { %v1303_v13 = vpop.f32.mrf.mxu1  ;;  %v1901_v21 = vpop.eup %1900  ;;  %1930 = vrcp.f32 %v1393_v5  ;;  %v1468_v46 = vmul.f32 %v1899_v12, %v1460_v34 }
 0x27d   : > { %v1903_v24 = vpop.eup %1902  ;;  %v1304_v26 = vadd.f32 %v1303_v13, %v1143_v20  ;;  %1932 = vtanh.f32 %v1302_v6 }
 0x27e   : > { %v1905_v22 = vpop.eup %1904  ;;  %1934 = vrcp.f32 %v1385_v7  ;;  %v1469_v31 = vmul.f32 %v1903_v24, %v1461_v43 }
 0x27f   : > { %v1907_v9 = vpop.eup %1906  ;;  %1936 = vtanh.f32 %v1304_v26  ;;  %v1398_v55 = vadd.f32 1.0, %v1905_v22 }
 0x280   : > { %v1909_v14 = vpop.eup %1908  ;;  %1938 = vrcp.f32 %v1394_v27  ;;  %v1470_v0 = vmul.f32 %v1907_v9, %v1462_v28 }
 0x281   : > { %v1911_v18 = vpop.eup %1910  ;;  %v1474_v11 = vmul.f32 %v1909_v14, %v2875_v23 }
 0x282   : > { %v1913_v32 = vpop.eup %1912  ;;  %v1399_v58 = vadd.f32 1.0, %v1911_v18 }
 0x283   : > { %v1915_v36 = vpop.eup %1914  ;;  %v1482_v37 = vadd.f32 %v1474_v11, %v1466_v30  ;;  %v1475_v39 = vmul.f32 %v1913_v32, %v2877_v8  ;;  %v1397_v8 = vadd.f32 1.0, %v1901_v21 }
 0x284   : > { %v1917_v41 = vpop.eup %1916  ;;  %v1471_v60 = vmul.f32 %v1915_v36, %v1463_v56 }
 0x285   : > { %v1919_v44 = vpop.eup %1918  ;;  %1940 = vtanh.f32 %v1482_v37  ;;  %1514 = vst [vmem:[%s2910_s16] sm:$0xff] %v1482_v37  ;;  %v1483_v23 = vadd.f32 %v1475_v39, %v1467_v38  ;;  %v1476_v47 = vmul.f32 %v1917_v41, %v2879_v29 }
 0x286   : > { %v1921_v48 = vpop.eup %1920  ;;  %1942 = vrcp.f32 %v1395_v33  ;;  %v1400_v3 = vadd.f32 1.0, %v1919_v44 }
 0x287   : > { %v1923_v49 = vpop.eup %1922  ;;  %1944 = vtanh.f32 %v1483_v23  ;;  %1515 = vst [vmem:[%s2910_s16 + $0x8] sm:$0xff] %v1483_v23  ;;  %v1484_v52 = vadd.f32 %v1476_v47, %v1468_v46  ;;  %v1477_v53 = vmul.f32 %v1921_v48, %v2882_v35 }
 0x288   : > { %v1925_v54 = vpop.eup %1924  ;;  %1946 = vrcp.f32 %v1396_v42  ;;  %v1472_v4 = vmul.f32 %v1923_v49, %v1464_v59 }
 0x289   : > { %v1927_v57 = vpop.eup %1926  ;;  %1948 = vtanh.f32 %v1484_v52  ;;  %1516 = vst [vmem:[%s2910_s16 + $0x10] sm:$0xff] %v1484_v52  ;;  %v1485_v29 = vadd.f32 %v1477_v53, %v1469_v31  ;;  %v1478_v2 = vmul.f32 %v1925_v54, %v2884_v40 }
 0x28a   : > { %v1929_v51 = vpop.eup %1928  ;;  %1950 = vrcp.f32 %v1397_v8  ;;  %v1401_v19 = vadd.f32 1.0, %v1927_v57 }
 0x28b   : > { %v1931_v1 = vpop.eup %1930  ;;  %1952 = vtanh.f32 %v1485_v29  ;;  %1517 = vst [vmem:[%s2910_s16 + $0x18] sm:$0xff] %v1485_v29  ;;  %v1486_v35 = vadd.f32 %v1478_v2, %v1470_v0  ;;  %v1479_v61 = vmul.f32 %v1929_v51, %v2886_v45 }
 0x28c   : > { %v1933_v62 = vpop.eup %1932  ;;  %1954 = vrcp.f32 %v1398_v55  ;;  %v1473_v5 = vmul.f32 %v1931_v1, %v1465_v63 }
 0x28d   : > { %v1935_v40 = vpop.eup %1934  ;;  %1956 = vtanh.f32 %v1486_v35  ;;  %1518 = vst [vmem:[%s2910_s16 + $0x20] sm:$0xff] %v1486_v35  ;;  %v1487_v15 = vadd.f32 %v1479_v61, %v1471_v60  ;;  %v1480_v16 = vmul.f32 %v1933_v62, %v2889_v50 }
 0x28e   : > { %v1937_v17 = vpop.eup %1936  ;;  %1958 = vrcp.f32 %v1399_v58 }
 0x28f   : > { %1960 = vtanh.f32 %v1487_v15  ;;  %1519 = vst [vmem:[%s2910_s16 + $0x28] sm:$0xff] %v1487_v15  ;;  %v1488_v45 = vadd.f32 %v1480_v16, %v1472_v4  ;;  %v1481_v12 = vmul.f32 %v1937_v17, %v1935_v40  ;;  %v1939_v20 = vpop.eup %1938 }
 0x290   : > { %1962 = vrcp.f32 %v1400_v3 }
 0x291   : > { %1964 = vtanh.f32 %v1488_v45  ;;  %1520 = vst [vmem:[%s2910_s16 + $0x30] sm:$0xff] %v1488_v45  ;;  %v1489_v6 = vadd.f32 %v1481_v12, %v1473_v5 }
 0x292   : > { %v1941_v50 = vpop.eup %1940  ;;  %1966 = vrcp.f32 %v1401_v19 }
 0x293   : > { %v1943_v13 = vpop.eup %1942  ;;  %v1498_v21 = vmul.f32 %v1941_v50, %v1939_v20  ;;  %1968 = vtanh.f32 %v1489_v6  ;;  %1521 = vst [vmem:[%s2910_s16 + $0x38] sm:$0xff] %v1489_v6 }
 0x294   : > { %v1945_v7 = vpop.eup %1944 }
 0x295   : > { %1983 = shalt.err (!%p1980_p3)
}
 0x296   : > { %s1984_s12 = scalar_lea.hbm %s2935_s6, 1024  ;;  %s1988_s16 = scalar_lea.hbm %s3023_s5, 2048 }
 0x297   : > { %p1985_p4 = scmp.ne.s32.totalorder %s2935_s6, %s1984_s12  ;;  %p1989_p9 = scmp.lt.s32.totalorder %s2935_s6, %s3023_s5 }
 0x298   : > { %p1990_p10 = scmp.lt.s32.totalorder %s1988_s16, %s1984_s12 }
 0x299   : > { %p1986_p7 = pnand %p1985_p4, %p2144_p5 }
 0x29a   : > { %p1991_p11 = por %p1990_p10, %p1989_p9 }
 0x29b   : > { %p1987_p8 = pneg %p1986_p7 }
 0x29d   : > { %p1992_p12 = pnand %p1991_p11, %p1987_p8 }
 0x29f   : > { %1995 = shalt.err (!%p1992_p12)
}
 0x2a0   : > { %s2073_s8 = smov 256   ;;  %s2074_s9 = smov 16   ;;  %v1947_v24 = vpop.eup %1946  ;;  %v1499_v26 = vmul.f32 %v1945_v7, %v1943_v13 }
 0x2a1   : > { %1785 = dma.vmem_to_hbm [thread:$0]  (%p2144_p5), %s2937_s23, 1024, %s2935_s6, %s1528_s7, %s2073_s8, %s2073_s8, %s2074_s9   ;;  %v1949_v22 = vpop.eup %1948 }
 0x2a2   : > { %s236_s10 = scalar_lea.vmem [#allocation2], %s1667_s15  ;;  %v1951_v25 = vpop.eup %1950  ;;  %v1500_v9 = vmul.f32 %v1949_v22, %v1947_v24  ;;  %s2973_s7 = scalar_lea.hbm %s3022_s4, %s1781_s17 }
 0x2a3   : > { %1506 = vst [vmem:[%s236_s10] sm:$0xff] %v1498_v21  ;;  %1507 = vst [vmem:[%s236_s10 + $0x8] sm:$0xff] %v1499_v26  ;;  %v1953_v14 = vpop.eup %1952  ;;  %s1541_s15 = sshll.u32 %s236_s10, 4  ;;  %s1523_s11 = scalar_lea.sflag [#allocation3], %s2899_s30  ;;  %s2975_s15 = int_to_ptr.vmem [resolvable:$true] %s1541_s15 }
 0x2a4   : > { %v1955_v27 = vpop.eup %1954  ;;  %1508 = vst [vmem:[%s236_s10 + $0x10] sm:$0xff] %v1500_v9  ;;  %v1501_v10 = vmul.f32 %v1953_v14, %v1951_v25  ;;  %s1996_s12 = scalar_lea.vmem %s2975_s15, 1024  ;;  %s2075_s13 = smov [#allocation2]  }
 0x2a5   : > { %v1957_v18 = vpop.eup %1956  ;;  %p1997_p13 = scmp.ne.s32.totalorder %s2975_s15, %s1996_s12  ;;  %s2000_s14 = sshll.u32 %s2075_s13, 4  ;;  %s2001_s14 = int_to_ptr.vmem [resolvable:$false] %s2000_s14 }
 0x2a6   : > { %v1959_v30 = vpop.eup %1958  ;;  %1509 = vst [vmem:[%s236_s10 + $0x18] sm:$0xff] %v1501_v10  ;;  %v1502_v11 = vmul.f32 %v1957_v18, %v1955_v27  ;;  %s2002_s22 = scalar_lea.vmem %s2001_s14, 2048  ;;  %p2003_p2 = scmp.lt.s32.totalorder %s2975_s15, %s2001_s14 }
 0x2a7   : > { %v1961_v32 = vpop.eup %1960  ;;  %p1998_p0 = pnand %p1997_p13, %p2144_p5  ;;  %p2004_p3 = scmp.lt.s32.totalorder %s2002_s22, %s1996_s12 }
 0x2a8   : > { %v1963_v33 = vpop.eup %1962  ;;  %1510 = vst [vmem:[%s236_s10 + $0x20] sm:$0xff] %v1502_v11  ;;  %v1503_v34 = vmul.f32 %v1961_v32, %v1959_v30 }
 0x2a9   : > { %v1965_v36 = vpop.eup %1964  ;;  %p1999_p1 = pneg %p1998_p0  ;;  %p2005_p4 = por %p2004_p3, %p2003_p2 }
 0x2aa   : > { %v1967_v37 = vpop.eup %1966  ;;  %1511 = vst [vmem:[%s236_s10 + $0x28] sm:$0xff] %v1503_v34  ;;  %v1504_v38 = vmul.f32 %v1965_v36, %v1963_v33 }
 0x2ab   : > { %v1969_v39 = vpop.eup %1968  ;;  %p2006_p7 = pnand %p2005_p4, %p1999_p1 }
 0x2ac   : > { %1512 = vst [vmem:[%s236_s10 + $0x30] sm:$0xff] %v1504_v38  ;;  %v1505_v41 = vmul.f32 %v1969_v39, %v1967_v37 }
 0x2ae   : > { %1513 = vst [vmem:[%s236_s10 + $0x38] sm:$0xff] %v1505_v41 }
 0x2af   : > { %2009 = shalt.err (!%p2006_p7)
}
 0x2b0   : > { %s2010_s17 = scalar_lea.hbm %s2973_s7, 1024  ;;  %s2014_s25 = scalar_lea.hbm %s3022_s4, 2048 }
 0x2b1   : > { %p2011_p8 = scmp.ne.s32.totalorder %s2973_s7, %s2010_s17  ;;  %p2015_p11 = scmp.lt.s32.totalorder %s2973_s7, %s3022_s4 }
 0x2b2   : > { %p2016_p12 = scmp.lt.s32.totalorder %s2014_s25, %s2010_s17 }
 0x2b3   : > { %p2012_p9 = pnand %p2011_p8, %p2144_p5 }
 0x2b4   : > { %p2017_p13 = por %p2016_p12, %p2015_p11 }
 0x2b5   : > { %p2013_p10 = pneg %p2012_p9 }
 0x2b7   : > { %p2018_p0 = pnand %p2017_p13, %p2013_p10 }
 0x2b9   : > { %2021 = shalt.err (!%p2018_p0)
}
 0x2ba   : > { %1784 = dma.vmem_to_hbm [thread:$0]  (%p2144_p5), %s2975_s15, 1024, %s2973_s7, %s1523_s11, %s2073_s8, %s2073_s8, %s2074_s9  }
 0x2bb PF: > { %p1795_p1 = scmp.ge.s32.totalorder %s2060_s21, 2  ;;  %s1572_s23 = sand.u32 1, %s2048_s18  }
 0x2bc   : > { %s1573_s6 = scalar_lea.sflag [#allocation3], %s1572_s23 }
 0x2bd   : > { %p1789_p2 = pnand %p1795_p1, %p2148_p6 }
 0x2bf   : > { %p1790_p3 = pneg %p1789_p2 }
 0x2c1   : > { %2039 = dma.done.wait (%p1790_p3), %s1573_s6, 1024  }
 0x2c2   : > { %2041 = vsyncadd (%p1790_p3), %s1573_s6, 4294966272  ;;  %s1582_s12 = scalar_lea.sflag [#allocation5], %s1572_s23 }
 0x2c3   : > { %2043 = dma.done.wait (%p1790_p3), %s1582_s12, 1024  }
 0x2c4   : > { %2045 = vsyncadd (%p1790_p3), %s1582_s12, 4294966272  ;;  %p19_p5 = scmp.ge.s32.totalorder %s2131_s24, 4   ;;  %s3034_s18 = smov %s2052_s19 }
 0x2c5   : > { %s3035_s19 = smov %s2056_s20  ;;  %s3036_s20 = smov %s2142_s27 }
 0x2c6   : > { %s3037_s21 = smov %s2131_s24  ;;  %21 = sbr.rel (!%p19_p5) target bundleno = 5 (0x5), region = 91 }
 0x2cb   :  { %1587 = vsyncpa [#allocation3], 1 }
 0x2cc   :  { %1589 = vsyncpa [#allocation3 + $0x1], 1 }
 0x2cd   :  { %1590 = vsyncpa [#allocation5], 1 }
 0x2ce   :  { %1592 = vsyncpa [#allocation5 + $0x1], 1 }

</bundles_post_ra>
